<compile_context>
chip_gen: v6e
topology: v6e:2x2x1
jax: 0.10.0
libtpu: 0.0.40
codegen_flags: <defaults>
</compile_context>

<pallas_src>
import functools

import jax
import jax.numpy as jnp
from jax import lax
from jax.experimental import pallas as pl
from jax.experimental.pallas import tpu as pltpu


# ----------------------------------------------------------------------------- helpers
def _round_up(x, m):
    return (x + m - 1) // m * m


def _lanes(c):
    return max(128, _round_up(c, 128))


def _vmem_budget():
    # Generation-aware scoped-VMEM budget: ~half of physical VMEM
    # (32 MiB on v7x's 64 MiB parts, 64 MiB on v5e/v6e's 128 MiB parts).
    try:
        cap = int(pltpu.get_tpu_info().vmem_capacity_bytes)
    except Exception:
        cap = 64 * 1024 * 1024
    return int(min(max(cap // 2, 16 * 1024 * 1024), 64 * 1024 * 1024))


_VMEM_BUDGET = _vmem_budget()


def _pick_tm(M, k_total, tn):
    # Largest M tile <= 512 that still yields >= 2 parallel M blocks (keep both v7x
    # TensorCores fed), rounded to a sublane multiple, shrunk if VMEM would overflow.
    tm = max(8, min(512, _round_up(pl.cdiv(M, 2), 8)))

    def need(t):
        # double-buffered bf16 input streams + f32 bias + double-buffered output blocks
        return 2 * (t * k_total + k_total * tn) * 2 + 2 * (t * tn) * 4 + tn * 4

    while tm > 8 and need(tm) > _VMEM_BUDGET:
        tm = max(8, _round_up(tm // 2, 8))
    return tm


# ----------------------------------------------------------------------------- kernels
def _mm_bias_act_kernel(a_ref, w_ref, b_ref, o_ref, *, relu):
    """Single-shot weight-resident matmul: o = act(a @ w + bias)."""
    y = jnp.dot(a_ref[...], w_ref[...], preferred_element_type=jnp.float32) + b_ref[...]
    if relu:
        y = jnp.maximum(y, 0.0)
    o_ref[...] = y.astype(o_ref.dtype)


def _dual_mm_bias_act_kernel(a1_ref, w1_ref, a2_ref, w2_ref, b_ref, o_ref, *, relu):
    """Fused conv3 + shortcut conv4: o = act(a1 @ w1 + a2 @ w2 + bias); separate K per path."""
    y = jnp.dot(a1_ref[...], w1_ref[...], preferred_element_type=jnp.float32)
    y = y + jnp.dot(a2_ref[...], w2_ref[...], preferred_element_type=jnp.float32)
    y = y + b_ref[...]
    if relu:
        y = jnp.maximum(y, 0.0)
    o_ref[...] = y.astype(o_ref.dtype)


def _conv2_implicit_kernel(x_ref, w_ref, b_ref, o_ref, *, k, sh, Ho, Wo, relu):
    """Implicit-GEMM kxk conv for one image / one output-channel tile.

    x_ref: (k, sh, H2*Wo, Cin_p)  W-tap-gathered, H-phase-split activation slab (bf16)
    w_ref: (k*k, Cin_p, tn)       per-tap weights with BN scale folded into columns (bf16)
    b_ref: (1, tn) f32 bias;  o_ref: (Ho*Wo, tn)
    """
    acc = jnp.zeros(o_ref.shape, jnp.float32)
    for di in range(k):
        qi, ri = di // sh, di % sh
        for dj in range(k):
            # Contiguous, sublane-aligned static row range: rows h2 in [qi, qi+Ho) x all wo.
            a = x_ref[dj, ri, pl.ds(qi * Wo, Ho * Wo), :]
            acc = acc + jnp.dot(a, w_ref[di * k + dj], preferred_element_type=jnp.float32)
    y = acc + b_ref[...]
    if relu:
        y = jnp.maximum(y, 0.0)
    o_ref[...] = y.astype(o_ref.dtype)


# ----------------------------------------------------------------------------- pallas wrappers
def matmul_bias_act(a, w, bias, relu=True, out_dtype=jnp.bfloat16):
    """out = act(a @ w + bias); bf16 MXU inputs, f32 accumulation, weight fully VMEM-resident."""
    M, K = a.shape
    Kw, Np = w.shape
    assert K == Kw, (K, Kw)
    tn = min(Np, 512)
    tm = _pick_tm(M, K, tn)
    grid = (pl.cdiv(M, tm), pl.cdiv(Np, tn))
    out_bytes = M * Np * jnp.dtype(out_dtype).itemsize
    return pl.pallas_call(
        functools.partial(_mm_bias_act_kernel, relu=relu),
        out_shape=jax.ShapeDtypeStruct((M, Np), out_dtype),
        grid=grid,
        in_specs=[
            pl.BlockSpec((tm, K), lambda i, j: (i, 0)),
            pl.BlockSpec((K, tn), lambda i, j: (0, j)),
            pl.BlockSpec((1, tn), lambda i, j: (0, j)),
        ],
        out_specs=pl.BlockSpec((tm, tn), lambda i, j: (i, j)),
        compiler_params=pltpu.CompilerParams(
            dimension_semantics=("parallel", "parallel"),
            vmem_limit_bytes=_VMEM_BUDGET),
        cost_estimate=pl.CostEstimate(
            flops=2 * M * Np * K, transcendentals=0,
            bytes_accessed=2 * M * K + 2 * K * Np + 4 * Np + out_bytes),
    )(a, w, bias)


def dual_matmul_bias_act(a1, w1, a2, w2, bias, relu=True, out_dtype=jnp.float32):
    """out = act(a1 @ w1 + a2 @ w2 + bias); fuses conv3 + shortcut conv4 + add + ReLU."""
    M, K1 = a1.shape
    M2, K2 = a2.shape
    assert M == M2, (M, M2)
    Np = w1.shape[1]
    assert w1.shape[0] == K1 and w2.shape == (K2, Np)
    tn = min(Np, 512)
    tm = _pick_tm(M, K1 + K2, tn)
    grid = (pl.cdiv(M, tm), pl.cdiv(Np, tn))
    out_bytes = M * Np * jnp.dtype(out_dtype).itemsize
    return pl.pallas_call(
        functools.partial(_dual_mm_bias_act_kernel, relu=relu),
        out_shape=jax.ShapeDtypeStruct((M, Np), out_dtype),
        grid=grid,
        in_specs=[
            pl.BlockSpec((tm, K1), lambda i, j: (i, 0)),
            pl.BlockSpec((K1, tn), lambda i, j: (0, j)),
            pl.BlockSpec((tm, K2), lambda i, j: (i, 0)),
            pl.BlockSpec((K2, tn), lambda i, j: (0, j)),
            pl.BlockSpec((1, tn), lambda i, j: (0, j)),
        ],
        out_specs=pl.BlockSpec((tm, tn), lambda i, j: (i, j)),
        compiler_params=pltpu.CompilerParams(
            dimension_semantics=("parallel", "parallel"),
            vmem_limit_bytes=_VMEM_BUDGET),
        cost_estimate=pl.CostEstimate(
            flops=2 * M * Np * (K1 + K2), transcendentals=0,
            bytes_accessed=2 * M * (K1 + K2) + 2 * (K1 + K2) * Np + 4 * Np + out_bytes),
    )(a1, w1, a2, w2, bias)


def conv2d_implicit_gemm(y_nhwc, w_taps, bias, *, k, strides, pad, relu=True,
                         out_dtype=jnp.bfloat16):
    """kxk strided conv + BN + ReLU as an implicit GEMM (tap loop inside the kernel)."""
    N, H, W, Cp = y_nhwc.shape
    sh, sw = strides
    kk, Cp_w, Cop = w_taps.shape
    assert kk == k * k and Cp_w == Cp
    Ho = (H + 2 * pad - k) // sh + 1
    Wo = (W + 2 * pad - k) // sw + 1
    Hp = _round_up(H + 2 * pad, sh)
    H2 = Hp // sh

    # One small wrapper-side reorg (~k/sw x |y|, vs k*k x for an im2col slab): pad spatially,
    # gather the k W-taps (stride sw), split H into (H2, sh) phases and flatten (H2, Wo) so
    # every tap becomes a contiguous, 8-sublane-aligned row range inside the kernel.
    yp = jnp.pad(y_nhwc, ((0, 0), (pad, Hp - H - pad), (pad, pad), (0, 0)))
    cols = jnp.stack([yp[:, :, dj:dj + sw * (Wo - 1) + 1:sw, :] for dj in range(k)], axis=0)
    xps = cols.reshape(k, N, H2, sh, Wo, Cp).transpose(0, 3, 1, 2, 4, 5)
    xps = xps.reshape(k, sh, N, H2 * Wo, Cp)

    tn = min(Cop, 512)
    grid = (N, pl.cdiv(Cop, tn))
    out_bytes = N * Ho * Wo * Cop * jnp.dtype(out_dtype).itemsize
    out = pl.pallas_call(
        functools.partial(_conv2_implicit_kernel, k=k, sh=sh, Ho=Ho, Wo=Wo, relu=relu),
        out_shape=jax.ShapeDtypeStruct((N, Ho * Wo, Cop), out_dtype),
        grid=grid,
        in_specs=[
            pl.BlockSpec((k, sh, None, H2 * Wo, Cp), lambda n, j: (0, 0, n, 0, 0)),
            pl.BlockSpec((kk, Cp, tn), lambda n, j: (0, 0, j)),
            pl.BlockSpec((1, tn), lambda n, j: (0, j)),
        ],
        out_specs=pl.BlockSpec((None, Ho * Wo, tn), lambda n, j: (n, 0, j)),
        compiler_params=pltpu.CompilerParams(
            dimension_semantics=("parallel", "parallel"),
            vmem_limit_bytes=_VMEM_BUDGET),
        cost_estimate=pl.CostEstimate(
            flops=2 * N * Ho * Wo * Cop * Cp * k * k, transcendentals=0,
            bytes_accessed=2 * xps.size + 2 * w_taps.size + 4 * Cop + out_bytes),
    )(xps, w_taps, bias)
    return out, (Ho, Wo)


# ----------------------------------------------------------------------------- param folding
def _bn_fold(gamma, beta, mean, var, eps=1e-5):
    scale = gamma / jnp.sqrt(var + eps)
    bias = beta - mean * scale
    return scale, bias


def _w1x1(w_oihw, scale, cin_p, cout_p):
    """[Cout, Cin, 1, 1] -> bf16 [Cin_p, Cout_p] with BN scale folded into the columns."""
    cout, cin = w_oihw.shape[0], w_oihw.shape[1]
    w = w_oihw.reshape(cout, cin).T * scale[None, :]
    return jnp.pad(w, ((0, cin_p - cin), (0, cout_p - cout))).astype(jnp.bfloat16)


def _wkxk_taps(w_oihw, scale, cin_p, cout_p):
    """[Cout, Cin, kh, kw] -> bf16 [kh*kw, Cin_p, Cout_p] (tap index = di*kw + dj)."""
    cout, cin, kh, kw = w_oihw.shape
    w = jnp.transpose(w_oihw, (2, 3, 1, 0)).reshape(kh * kw, cin, cout) * scale[None, None, :]
    return jnp.pad(w, ((0, 0), (0, cin_p - cin), (0, cout_p - cout))).astype(jnp.bfloat16)


def _bias_row(b, cout_p):
    return jnp.pad(b, (0, cout_p - b.shape[0])).reshape(1, cout_p).astype(jnp.float32)


# ----------------------------------------------------------------------------- module
def init_bottleneck_params(key, inplanes, planes, kernel_size):
    p1, p2, p3 = planes
    ks = jax.random.split(key, 8)

    def conv_w(k_, cout, cin, kh, kw):
        fan_in = cin * kh * kw
        return jax.random.normal(k_, (cout, cin, kh, kw), jnp.float32) / jnp.sqrt(fan_in)

    def bn_params(k_, c):
        kg, kb, km, kv = jax.random.split(k_, 4)
        gamma = 1.0 + 0.1 * jax.random.normal(kg, (c,), jnp.float32)
        beta = 0.1 * jax.random.normal(kb, (c,), jnp.float32)
        mean = 0.1 * jax.random.normal(km, (c,), jnp.float32)
        var = jnp.abs(jax.random.normal(kv, (c,), jnp.float32)) + 0.5
        return gamma, beta, mean, var

    return {
        "conv1": conv_w(ks[0], p1, inplanes, 1, 1), "bn1": bn_params(ks[1], p1),
        "conv2": conv_w(ks[2], p2, p1, kernel_size, kernel_size), "bn2": bn_params(ks[3], p2),
        "conv3": conv_w(ks[4], p3, p2, 1, 1), "bn3": bn_params(ks[5], p3),
        "conv4": conv_w(ks[6], p3, inplanes, 1, 1), "bn4": bn_params(ks[7], p3),
    }


def bottleneck_forward(x_nchw, params, kernel_size=3, strides=(2, 2)):
    sh, sw = strides
    k = kernel_size
    pad = (k - 1) // 2
    N, Cin, H, W = x_nchw.shape

    p1 = params["conv1"].shape[0]
    p2 = params["conv2"].shape[0]
    p3 = params["conv3"].shape[0]
    cin_p, c1p, c2p, c3p = _lanes(Cin), _lanes(p1), _lanes(p2), _lanes(p3)

    s1, b1 = _bn_fold(*params["bn1"])
    s2, b2 = _bn_fold(*params["bn2"])
    s3, b3 = _bn_fold(*params["bn3"])
    s4, b4 = _bn_fold(*params["bn4"])

    # Fold BN scales into bf16 weight columns; keep f32 biases only (no scale stream).
    w1 = _w1x1(params["conv1"], s1, cin_p, c1p)
    w2 = _wkxk_taps(params["conv2"], s2, c1p, c2p)
    w3 = _w1x1(params["conv3"], s3, c2p, c3p)
    w4 = _w1x1(params["conv4"], s4, cin_p, c3p)
    b1p = _bias_row(b1, c1p)
    b2p = _bias_row(b2, c2p)
    b34p = _bias_row(b3 + b4, c3p)

    # Input: NCHW -> NHWC, channel-pad to a lane multiple, bf16 (one fused XLA copy).
    # Activations stay channel-padded, lane-dense bf16 across all stages.
    x = jnp.transpose(x_nchw, (0, 2, 3, 1)).astype(jnp.bfloat16)
    x = jnp.pad(x, ((0, 0), (0, 0), (0, 0), (0, cin_p - Cin)))

    # conv1 (1x1, stride 1) + bn1 + relu: single-shot weight-resident matmul.
    y1 = matmul_bias_act(x.reshape(N * H * W, cin_p), w1, b1p,
                         relu=True, out_dtype=jnp.bfloat16)
    y1 = y1.reshape(N, H, W, c1p)

    # conv2 (kxk, stride s, pad p) + bn2 + relu: implicit GEMM (no k*k im2col slab).
    y2, (Ho, Wo) = conv2d_implicit_gemm(y1, w2, b2p, k=k, strides=strides, pad=pad,
                                        relu=True, out_dtype=jnp.bfloat16)

    # conv3 (1x1) + bn3  and  shortcut conv4 (1x1, stride s) + bn4, fused into ONE kernel
    # with separate K extents per path, single bias + ReLU epilogue.
    # TODO(synk): fold the shortcut's spatial stride into the kernel's index_map instead of
    # this wrapper-level strided slice.
    xs = x[:, ::sh, ::sw, :].reshape(N * Ho * Wo, cin_p)
    out = dual_matmul_bias_act(y2.reshape(N * Ho * Wo, c2p), w3, xs, w4, b34p,
                               relu=True, out_dtype=jnp.float32)

    out = out[:, :p3].reshape(N, Ho, Wo, p3)
    return jnp.transpose(out, (0, 3, 1, 2))                       # back to NCHW


# ----------------------------------------------------------------------------- reference
def reference_forward(x_nchw, params, kernel_size=3, strides=(2, 2)):
    pad = (kernel_size - 1) // 2

    def conv(x, w, stride, p):
        return lax.conv_general_dilated(
            x, w, window_strides=stride, padding=[(p, p), (p, p)],
            dimension_numbers=("NCHW", "OIHW", "NCHW"))

    def bn(x, prm):
        scale, bias = _bn_fold(*prm)
        return x * scale[None, :, None, None] + bias[None, :, None, None]

    out = jnp.maximum(bn(conv(x_nchw, params["conv1"], (1, 1), 0), params["bn1"]), 0.0)
    out = jnp.maximum(bn(conv(out, params["conv2"], strides, pad), params["bn2"]), 0.0)
    out = bn(conv(out, params["conv3"], (1, 1), 0), params["bn3"])
    sc = bn(conv(x_nchw, params["conv4"], strides, 0), params["bn4"])
    return jnp.maximum(out + sc, 0.0)


# ----------------------------------------------------------------------------- main
if __name__ == "__main__":
    key = jax.random.PRNGKey(0)
    k_x, k_p = jax.random.split(key)

    inplanes, planes, kernel_size, strides = 4, (8, 8, 16), 3, (2, 2)
    x = jax.random.normal(k_x, (2, inplanes, 16, 16), jnp.float32)   # NCHW like PyTorch
    params = init_bottleneck_params(k_p, inplanes, planes, kernel_size)

    fwd = jax.jit(functools.partial(bottleneck_forward,
                                    kernel_size=kernel_size, strides=strides))
    out = jax.block_until_ready(fwd(x, params))

    ref = jax.block_until_ready(reference_forward(x, params, kernel_size, strides))
    assert out.shape == (2, planes[2], 8, 8), out.shape
    # bf16 MXU inputs with BN scales folded into weights (f32 accumulation) => loose tolerance.
    assert jnp.allclose(out, ref, rtol=5e-2, atol=5e-2), "mismatch vs JAX reference"

    print("KERNEL_OK")
</pallas_src>

<mosaic_0001>
module attributes {stable_mosaic.version = 11 : i64} {
  func.func @_mm_bias_act_kernel(%arg0: i32, %arg1: i32, %arg2: memref<256x128xbf16, #tpu.memory_space<vmem>>, %arg3: memref<128x128xbf16, #tpu.memory_space<vmem>>, %arg4: memref<1x128xf32, #tpu.memory_space<vmem>>, %arg5: memref<256x128xbf16, #tpu.memory_space<vmem>>) attributes {dimension_semantics = [#tpu.dimension_semantics<parallel>, #tpu.dimension_semantics<parallel>], iteration_bounds = array<i64: 2, 1>, scalar_prefetch = 0 : i64, scratch_operands = 0 : i64, tpu.core_type = #tpu.core_type<tc>, window_params = [{transform_indices = @transform_0, window_bounds = array<i64: 256, 128>}, {transform_indices = @transform_1, window_bounds = array<i64: 128, 128>}, {transform_indices = @transform_2, window_bounds = array<i64: 1, 128>}, {transform_indices = @transform_3, window_bounds = array<i64: 256, 128>}]} {
    %c0 = arith.constant 0 : index
    %c0_0 = arith.constant 0 : index
    %0 = vector.load %arg2[%c0, %c0_0] : memref<256x128xbf16, #tpu.memory_space<vmem>>, vector<256x128xbf16>
    %c0_1 = arith.constant 0 : index
    %c0_2 = arith.constant 0 : index
    %1 = vector.load %arg3[%c0_1, %c0_2] : memref<128x128xbf16, #tpu.memory_space<vmem>>, vector<128x128xbf16>
    %cst = arith.constant dense<0.000000e+00> : vector<256x128xf32>
    %2 = tpu.matmul %0, %1, %cst {dimension_numbers = #tpu.dot_dimension_numbers<[1], [0], [0], [1], [0, 0, 1, 1], [], []>} : vector<256x128xbf16>, vector<128x128xbf16>, vector<256x128xf32> -> vector<256x128xf32>
    %c0_3 = arith.constant 0 : index
    %c0_4 = arith.constant 0 : index
    %3 = vector.load %arg4[%c0_3, %c0_4] : memref<1x128xf32, #tpu.memory_space<vmem>>, vector<1x128xf32>
    %4 = vector.broadcast %3 : vector<1x128xf32> to vector<256x128xf32>
    %5 = arith.addf %2, %4 : vector<256x128xf32>
    %cst_5 = arith.constant 0.000000e+00 : f32
    %6 = vector.broadcast %cst_5 : f32 to vector<256x128xf32>
    %7 = arith.maximumf %5, %6 : vector<256x128xf32>
    %8 = arith.truncf %7 : vector<256x128xf32> to vector<256x128xbf16>
    %c0_6 = arith.constant 0 : index
    %c0_7 = arith.constant 0 : index
    %9 = vector.load %arg5[%c0_6, %c0_7] : memref<256x128xbf16, #tpu.memory_space<vmem>>, vector<256x128xbf16>
    tpu.vector_store %arg5[%c0_6, %c0_7], %8 {strides = array<i32>} : memref<256x128xbf16, #tpu.memory_space<vmem>>, vector<256x128xbf16>,
    return
  }
  func.func @transform_0(%arg0: i32, %arg1: i32) -> (i32, i32) {
    %c0_i32 = arith.constant 0 : i32
    %c0_i32_0 = arith.constant 0 : i32
    return %arg0, %c0_i32 : i32, i32
  }
  func.func @transform_1(%arg0: i32, %arg1: i32) -> (i32, i32) {
    %c0_i32 = arith.constant 0 : i32
    %c0_i32_0 = arith.constant 0 : i32
    return %c0_i32, %arg1 : i32, i32
  }
  func.func @transform_2(%arg0: i32, %arg1: i32) -> (i32, i32) {
    %c0_i32 = arith.constant 0 : i32
    %c0_i32_0 = arith.constant 0 : i32
    return %c0_i32, %arg1 : i32, i32
  }
  func.func @transform_3(%arg0: i32, %arg1: i32) -> (i32, i32) {
    %c0_i32 = arith.constant 0 : i32
    return %arg0, %arg1 : i32, i32
  }
}

module attributes {stable_mosaic.version = 11 : i64} {
  func.func @_conv2_implicit_kernel(%arg0: i32, %arg1: i32, %arg2: memref<3x2x1x72x128xbf16, #tpu.memory_space<vmem>>, %arg3: memref<9x128x128xbf16, #tpu.memory_space<vmem>>, %arg4: memref<1x128xf32, #tpu.memory_space<vmem>>, %arg5: memref<1x64x128xbf16, #tpu.memory_space<vmem>>) attributes {dimension_semantics = [#tpu.dimension_semantics<parallel>, #tpu.dimension_semantics<parallel>], iteration_bounds = array<i64: 2, 1>, scalar_prefetch = 0 : i64, scratch_operands = 0 : i64, tpu.core_type = #tpu.core_type<tc>, window_params = [{transform_indices = @transform_0, window_bounds = array<i64: 3, 2, 1, 72, 128>}, {transform_indices = @transform_1, window_bounds = array<i64: 9, 128, 128>}, {transform_indices = @transform_2, window_bounds = array<i64: 1, 128>}, {transform_indices = @transform_3, window_bounds = array<i64: 1, 64, 128>}]} {
    %cst = arith.constant 0.000000e+00 : f32
    %0 = vector.broadcast %cst : f32 to vector<64x128xf32>
    %c0 = arith.constant 0 : index
    %c0_0 = arith.constant 0 : index
    %c0_1 = arith.constant 0 : index
    %c0_2 = arith.constant 0 : index
    %c0_3 = arith.constant 0 : index
    %1 = vector.load %arg2[%c0, %c0_0, %c0_1, %c0_2, %c0_3] : memref<3x2x1x72x128xbf16, #tpu.memory_space<vmem>>, vector<1x1x1x64x128xbf16>
    %2 = vector.shape_cast %1 : vector<1x1x1x64x128xbf16> to vector<64x128xbf16>
    %c0_4 = arith.constant 0 : index
    %c0_5 = arith.constant 0 : index
    %c0_6 = arith.constant 0 : index
    %3 = vector.load %arg3[%c0_4, %c0_5, %c0_6] : memref<9x128x128xbf16, #tpu.memory_space<vmem>>, vector<1x128x128xbf16>
    %4 = vector.shape_cast %3 : vector<1x128x128xbf16> to vector<128x128xbf16>
    %cst_7 = arith.constant dense<0.000000e+00> : vector<64x128xf32>
    %5 = tpu.matmul %2, %4, %cst_7 {dimension_numbers = #tpu.dot_dimension_numbers<[1], [0], [0], [1], [0, 0, 1, 1], [], []>} : vector<64x128xbf16>, vector<128x128xbf16>, vector<64x128xf32> -> vector<64x128xf32>
    %6 = arith.addf %0, %5 : vector<64x128xf32>
    %c1 = arith.constant 1 : index
    %c0_8 = arith.constant 0 : index
    %c0_9 = arith.constant 0 : index
    %c0_10 = arith.constant 0 : index
    %c0_11 = arith.constant 0 : index
    %7 = vector.load %arg2[%c1, %c0_8, %c0_9, %c0_10, %c0_11] : memref<3x2x1x72x128xbf16, #tpu.memory_space<vmem>>, vector<1x1x1x64x128xbf16>
    %8 = vector.shape_cast %7 : vector<1x1x1x64x128xbf16> to vector<64x128xbf16>
    %c1_12 = arith.constant 1 : index
    %c0_13 = arith.constant 0 : index
    %c0_14 = arith.constant 0 : index
    %9 = vector.load %arg3[%c1_12, %c0_13, %c0_14] : memref<9x128x128xbf16, #tpu.memory_space<vmem>>, vector<1x128x128xbf16>
    %10 = vector.shape_cast %9 : vector<1x128x128xbf16> to vector<128x128xbf16>
    %cst_15 = arith.constant dense<0.000000e+00> : vector<64x128xf32>
    %11 = tpu.matmul %8, %10, %cst_15 {dimension_numbers = #tpu.dot_dimension_numbers<[1], [0], [0], [1], [0, 0, 1, 1], [], []>} : vector<64x128xbf16>, vector<128x128xbf16>, vector<64x128xf32> -> vector<64x128xf32>
    %12 = arith.addf %6, %11 : vector<64x128xf32>
    %c2 = arith.constant 2 : index
    %c0_16 = arith.constant 0 : index
    %c0_17 = arith.constant 0 : index
    %c0_18 = arith.constant 0 : index
    %c0_19 = arith.constant 0 : index
    %13 = vector.load %arg2[%c2, %c0_16, %c0_17, %c0_18, %c0_19] : memref<3x2x1x72x128xbf16, #tpu.memory_space<vmem>>, vector<1x1x1x64x128xbf16>
    %14 = vector.shape_cast %13 : vector<1x1x1x64x128xbf16> to vector<64x128xbf16>
    %c2_20 = arith.constant 2 : index
    %c0_21 = arith.constant 0 : index
    %c0_22 = arith.constant 0 : index
    %15 = vector.load %arg3[%c2_20, %c0_21, %c0_22] : memref<9x128x128xbf16, #tpu.memory_space<vmem>>, vector<1x128x128xbf16>
    %16 = vector.shape_cast %15 : vector<1x128x128xbf16> to vector<128x128xbf16>
    %cst_23 = arith.constant dense<0.000000e+00> : vector<64x128xf32>
    %17 = tpu.matmul %14, %16, %cst_23 {dimension_numbers = #tpu.dot_dimension_numbers<[1], [0], [0], [1], [0, 0, 1, 1], [], []>} : vector<64x128xbf16>, vector<128x128xbf16>, vector<64x128xf32> -> vector<64x128xf32>
    %18 = arith.addf %12, %17 : vector<64x128xf32>
    %c0_24 = arith.constant 0 : index
    %c1_25 = arith.constant 1 : index
    %c0_26 = arith.constant 0 : index
    %c0_27 = arith.constant 0 : index
    %c0_28 = arith.constant 0 : index
    %19 = vector.load %arg2[%c0_24, %c1_25, %c0_26, %c0_27, %c0_28] : memref<3x2x1x72x128xbf16, #tpu.memory_space<vmem>>, vector<1x1x1x64x128xbf16>
    %20 = vector.shape_cast %19 : vector<1x1x1x64x128xbf16> to vector<64x128xbf16>
    %c3 = arith.constant 3 : index
    %c0_29 = arith.constant 0 : index
    %c0_30 = arith.constant 0 : index
    %21 = vector.load %arg3[%c3, %c0_29, %c0_30] : memref<9x128x128xbf16, #tpu.memory_space<vmem>>, vector<1x128x128xbf16>
    %22 = vector.shape_cast %21 : vector<1x128x128xbf16> to vector<128x128xbf16>
    %cst_31 = arith.constant dense<0.000000e+00> : vector<64x128xf32>
    %23 = tpu.matmul %20, %22, %cst_31 {dimension_numbers = #tpu.dot_dimension_numbers<[1], [0], [0], [1], [0, 0, 1, 1], [], []>} : vector<64x128xbf16>, vector<128x128xbf16>, vector<64x128xf32> -> vector<64x128xf32>
    %24 = arith.addf %18, %23 : vector<64x128xf32>
    %c1_32 = arith.constant 1 : index
    %c1_33 = arith.constant 1 : index
    %c0_34 = arith.constant 0 : index
    %c0_35 = arith.constant 0 : index
    %c0_36 = arith.constant 0 : index
    %25 = vector.load %arg2[%c1_32, %c1_33, %c0_34, %c0_35, %c0_36] : memref<3x2x1x72x128xbf16, #tpu.memory_space<vmem>>, vector<1x1x1x64x128xbf16>
    %26 = vector.shape_cast %25 : vector<1x1x1x64x128xbf16> to vector<64x128xbf16>
    %c4 = arith.constant 4 : index
    %c0_37 = arith.constant 0 : index
    %c0_38 = arith.constant 0 : index
    %27 = vector.load %arg3[%c4, %c0_37, %c0_38] : memref<9x128x128xbf16, #tpu.memory_space<vmem>>, vector<1x128x128xbf16>
    %28 = vector.shape_cast %27 : vector<1x128x128xbf16> to vector<128x128xbf16>
    %cst_39 = arith.constant dense<0.000000e+00> : vector<64x128xf32>
    %29 = tpu.matmul %26, %28, %cst_39 {dimension_numbers = #tpu.dot_dimension_numbers<[1], [0], [0], [1], [0, 0, 1, 1], [], []>} : vector<64x128xbf16>, vector<128x128xbf16>, vector<64x128xf32> -> vector<64x128xf32>
    %30 = arith.addf %24, %29 : vector<64x128xf32>
    %c2_40 = arith.constant 2 : index
    %c1_41 = arith.constant 1 : index
    %c0_42 = arith.constant 0 : index
    %c0_43 = arith.constant 0 : index
    %c0_44 = arith.constant 0 : index
    %31 = vector.load %arg2[%c2_40, %c1_41, %c0_42, %c0_43, %c0_44] : memref<3x2x1x72x128xbf16, #tpu.memory_space<vmem>>, vector<1x1x1x64x128xbf16>
    %32 = vector.shape_cast %31 : vector<1x1x1x64x128xbf16> to vector<64x128xbf16>
    %c5 = arith.constant 5 : index
    %c0_45 = arith.constant 0 : index
    %c0_46 = arith.constant 0 : index
    %33 = vector.load %arg3[%c5, %c0_45, %c0_46] : memref<9x128x128xbf16, #tpu.memory_space<vmem>>, vector<1x128x128xbf16>
    %34 = vector.shape_cast %33 : vector<1x128x128xbf16> to vector<128x128xbf16>
    %cst_47 = arith.constant dense<0.000000e+00> : vector<64x128xf32>
    %35 = tpu.matmul %32, %34, %cst_47 {dimension_numbers = #tpu.dot_dimension_numbers<[1], [0], [0], [1], [0, 0, 1, 1], [], []>} : vector<64x128xbf16>, vector<128x128xbf16>, vector<64x128xf32> -> vector<64x128xf32>
    %36 = arith.addf %30, %35 : vector<64x128xf32>
    %c0_48 = arith.constant 0 : index
    %c0_49 = arith.constant 0 : index
    %c0_50 = arith.constant 0 : index
    %c8 = arith.constant 8 : index
    %c0_51 = arith.constant 0 : index
    %37 = vector.load %arg2[%c0_48, %c0_49, %c0_50, %c8, %c0_51] : memref<3x2x1x72x128xbf16, #tpu.memory_space<vmem>>, vector<1x1x1x64x128xbf16>
    %38 = vector.shape_cast %37 : vector<1x1x1x64x128xbf16> to vector<64x128xbf16>
    %c6 = arith.constant 6 : index
    %c0_52 = arith.constant 0 : index
    %c0_53 = arith.constant 0 : index
    %39 = vector.load %arg3[%c6, %c0_52, %c0_53] : memref<9x128x128xbf16, #tpu.memory_space<vmem>>, vector<1x128x128xbf16>
    %40 = vector.shape_cast %39 : vector<1x128x128xbf16> to vector<128x128xbf16>
    %cst_54 = arith.constant dense<0.000000e+00> : vector<64x128xf32>
    %41 = tpu.matmul %38, %40, %cst_54 {dimension_numbers = #tpu.dot_dimension_numbers<[1], [0], [0], [1], [0, 0, 1, 1], [], []>} : vector<64x128xbf16>, vector<128x128xbf16>, vector<64x128xf32> -> vector<64x128xf32>
    %42 = arith.addf %36, %41 : vector<64x128xf32>
    %c1_55 = arith.constant 1 : index
    %c0_56 = arith.constant 0 : index
    %c0_57 = arith.constant 0 : index
    %c8_58 = arith.constant 8 : index
    %c0_59 = arith.constant 0 : index
    %43 = vector.load %arg2[%c1_55, %c0_56, %c0_57, %c8_58, %c0_59] : memref<3x2x1x72x128xbf16, #tpu.memory_space<vmem>>, vector<1x1x1x64x128xbf16>
    %44 = vector.shape_cast %43 : vector<1x1x1x64x128xbf16> to vector<64x128xbf16>
    %c7 = arith.constant 7 : index
    %c0_60 = arith.constant 0 : index
    %c0_61 = arith.constant 0 : index
    %45 = vector.load %arg3[%c7, %c0_60, %c0_61] : memref<9x128x128xbf16, #tpu.memory_space<vmem>>, vector<1x128x128xbf16>
    %46 = vector.shape_cast %45 : vector<1x128x128xbf16> to vector<128x128xbf16>
    %cst_62 = arith.constant dense<0.000000e+00> : vector<64x128xf32>
    %47 = tpu.matmul %44, %46, %cst_62 {dimension_numbers = #tpu.dot_dimension_numbers<[1], [0], [0], [1], [0, 0, 1, 1], [], []>} : vector<64x128xbf16>, vector<128x128xbf16>, vector<64x128xf32> -> vector<64x128xf32>
    %48 = arith.addf %42, %47 : vector<64x128xf32>
    %c2_63 = arith.constant 2 : index
    %c0_64 = arith.constant 0 : index
    %c0_65 = arith.constant 0 : index
    %c8_66 = arith.constant 8 : index
    %c0_67 = arith.constant 0 : index
    %49 = vector.load %arg2[%c2_63, %c0_64, %c0_65, %c8_66, %c0_67] : memref<3x2x1x72x128xbf16, #tpu.memory_space<vmem>>, vector<1x1x1x64x128xbf16>
    %50 = vector.shape_cast %49 : vector<1x1x1x64x128xbf16> to vector<64x128xbf16>
    %c8_68 = arith.constant 8 : index
    %c0_69 = arith.constant 0 : index
    %c0_70 = arith.constant 0 : index
    %51 = vector.load %arg3[%c8_68, %c0_69, %c0_70] : memref<9x128x128xbf16, #tpu.memory_space<vmem>>, vector<1x128x128xbf16>
    %52 = vector.shape_cast %51 : vector<1x128x128xbf16> to vector<128x128xbf16>
    %cst_71 = arith.constant dense<0.000000e+00> : vector<64x128xf32>
    %53 = tpu.matmul %50, %52, %cst_71 {dimension_numbers = #tpu.dot_dimension_numbers<[1], [0], [0], [1], [0, 0, 1, 1], [], []>} : vector<64x128xbf16>, vector<128x128xbf16>, vector<64x128xf32> -> vector<64x128xf32>
    %54 = arith.addf %48, %53 : vector<64x128xf32>
    %c0_72 = arith.constant 0 : index
    %c0_73 = arith.constant 0 : index
    %55 = vector.load %arg4[%c0_72, %c0_73] : memref<1x128xf32, #tpu.memory_space<vmem>>, vector<1x128xf32>
    %56 = vector.broadcast %55 : vector<1x128xf32> to vector<64x128xf32>
    %57 = arith.addf %54, %56 : vector<64x128xf32>
    %cst_74 = arith.constant 0.000000e+00 : f32
    %58 = vector.broadcast %cst_74 : f32 to vector<64x128xf32>
    %59 = arith.maximumf %57, %58 : vector<64x128xf32>
    %60 = arith.truncf %59 : vector<64x128xf32> to vector<64x128xbf16>
    %c0_75 = arith.constant 0 : index
    %c0_76 = arith.constant 0 : index
    %c0_77 = arith.constant 0 : index
    %61 = vector.load %arg5[%c0_75, %c0_76, %c0_77] : memref<1x64x128xbf16, #tpu.memory_space<vmem>>, vector<1x64x128xbf16>
    %62 = vector.shape_cast %61 : vector<1x64x128xbf16> to vector<64x128xbf16>
    %63 = vector.shape_cast %60 : vector<64x128xbf16> to vector<1x64x128xbf16>
    tpu.vector_store %arg5[%c0_75, %c0_76, %c0_77], %63 {strides = array<i32>} : memref<1x64x128xbf16, #tpu.memory_space<vmem>>, vector<1x64x128xbf16>,
    return
  }
  func.func @transform_0(%arg0: i32, %arg1: i32) -> (i32, i32, i32, i32, i32) {
    %c0_i32 = arith.constant 0 : i32
    %c0_i32_0 = arith.constant 0 : i32
    %c0_i32_1 = arith.constant 0 : i32
    %c0_i32_2 = arith.constant 0 : i32
    %c0_i32_3 = arith.constant 0 : i32
    return %c0_i32, %c0_i32_0, %arg0, %c0_i32_1, %c0_i32_2 : i32, i32, i32, i32, i32
  }
  func.func @transform_1(%arg0: i32, %arg1: i32) -> (i32, i32, i32) {
    %c0_i32 = arith.constant 0 : i32
    %c0_i32_0 = arith.constant 0 : i32
    %c0_i32_1 = arith.constant 0 : i32
    return %c0_i32, %c0_i32_0, %arg1 : i32, i32, i32
  }
  func.func @transform_2(%arg0: i32, %arg1: i32) -> (i32, i32) {
    %c0_i32 = arith.constant 0 : i32
    %c0_i32_0 = arith.constant 0 : i32
    return %c0_i32, %arg1 : i32, i32
  }
  func.func @transform_3(%arg0: i32, %arg1: i32) -> (i32, i32, i32) {
    %c0_i32 = arith.constant 0 : i32
    %c0_i32_0 = arith.constant 0 : i32
    return %arg0, %c0_i32, %arg1 : i32, i32, i32
  }
}

module attributes {stable_mosaic.version = 11 : i64} {
  func.func @_dual_mm_bias_act_kernel(%arg0: i32, %arg1: i32, %arg2: memref<64x128xbf16, #tpu.memory_space<vmem>>, %arg3: memref<128x128xbf16, #tpu.memory_space<vmem>>, %arg4: memref<64x128xbf16, #tpu.memory_space<vmem>>, %arg5: memref<128x128xbf16, #tpu.memory_space<vmem>>, %arg6: memref<1x128xf32, #tpu.memory_space<vmem>>, %arg7: memref<64x128xf32, #tpu.memory_space<vmem>>) attributes {dimension_semantics = [#tpu.dimension_semantics<parallel>, #tpu.dimension_semantics<parallel>], iteration_bounds = array<i64: 2, 1>, scalar_prefetch = 0 : i64, scratch_operands = 0 : i64, tpu.core_type = #tpu.core_type<tc>, window_params = [{transform_indices = @transform_0, window_bounds = array<i64: 64, 128>}, {transform_indices = @transform_1, window_bounds = array<i64: 128, 128>}, {transform_indices = @transform_2, window_bounds = array<i64: 64, 128>}, {transform_indices = @transform_3, window_bounds = array<i64: 128, 128>}, {transform_indices = @transform_4, window_bounds = array<i64: 1, 128>}, {transform_indices = @transform_5, window_bounds = array<i64: 64, 128>}]} {
    %c0 = arith.constant 0 : index
    %c0_0 = arith.constant 0 : index
    %0 = vector.load %arg2[%c0, %c0_0] : memref<64x128xbf16, #tpu.memory_space<vmem>>, vector<64x128xbf16>
    %c0_1 = arith.constant 0 : index
    %c0_2 = arith.constant 0 : index
    %1 = vector.load %arg3[%c0_1, %c0_2] : memref<128x128xbf16, #tpu.memory_space<vmem>>, vector<128x128xbf16>
    %cst = arith.constant dense<0.000000e+00> : vector<64x128xf32>
    %2 = tpu.matmul %0, %1, %cst {dimension_numbers = #tpu.dot_dimension_numbers<[1], [0], [0], [1], [0, 0, 1, 1], [], []>} : vector<64x128xbf16>, vector<128x128xbf16>, vector<64x128xf32> -> vector<64x128xf32>
    %c0_3 = arith.constant 0 : index
    %c0_4 = arith.constant 0 : index
    %3 = vector.load %arg4[%c0_3, %c0_4] : memref<64x128xbf16, #tpu.memory_space<vmem>>, vector<64x128xbf16>
    %c0_5 = arith.constant 0 : index
    %c0_6 = arith.constant 0 : index
    %4 = vector.load %arg5[%c0_5, %c0_6] : memref<128x128xbf16, #tpu.memory_space<vmem>>, vector<128x128xbf16>
    %cst_7 = arith.constant dense<0.000000e+00> : vector<64x128xf32>
    %5 = tpu.matmul %3, %4, %cst_7 {dimension_numbers = #tpu.dot_dimension_numbers<[1], [0], [0], [1], [0, 0, 1, 1], [], []>} : vector<64x128xbf16>, vector<128x128xbf16>, vector<64x128xf32> -> vector<64x128xf32>
    %6 = arith.addf %2, %5 : vector<64x128xf32>
    %c0_8 = arith.constant 0 : index
    %c0_9 = arith.constant 0 : index
    %7 = vector.load %arg6[%c0_8, %c0_9] : memref<1x128xf32, #tpu.memory_space<vmem>>, vector<1x128xf32>
    %8 = vector.broadcast %7 : vector<1x128xf32> to vector<64x128xf32>
    %9 = arith.addf %6, %8 : vector<64x128xf32>
    %cst_10 = arith.constant 0.000000e+00 : f32
    %10 = vector.broadcast %cst_10 : f32 to vector<64x128xf32>
    %11 = arith.maximumf %9, %10 : vector<64x128xf32>
    %c0_11 = arith.constant 0 : index
    %c0_12 = arith.constant 0 : index
    %12 = vector.load %arg7[%c0_11, %c0_12] : memref<64x128xf32, #tpu.memory_space<vmem>>, vector<64x128xf32>
    tpu.vector_store %arg7[%c0_11, %c0_12], %11 {strides = array<i32>} : memref<64x128xf32, #tpu.memory_space<vmem>>, vector<64x128xf32>,
    return
  }
  func.func @transform_0(%arg0: i32, %arg1: i32) -> (i32, i32) {
    %c0_i32 = arith.constant 0 : i32
    %c0_i32_0 = arith.constant 0 : i32
    return %arg0, %c0_i32 : i32, i32
  }
  func.func @transform_1(%arg0: i32, %arg1: i32) -> (i32, i32) {
    %c0_i32 = arith.constant 0 : i32
    %c0_i32_0 = arith.constant 0 : i32
    return %c0_i32, %arg1 : i32, i32
  }
  func.func @transform_2(%arg0: i32, %arg1: i32) -> (i32, i32) {
    %c0_i32 = arith.constant 0 : i32
    %c0_i32_0 = arith.constant 0 : i32
    return %arg0, %c0_i32 : i32, i32
  }
  func.func @transform_3(%arg0: i32, %arg1: i32) -> (i32, i32) {
    %c0_i32 = arith.constant 0 : i32
    %c0_i32_0 = arith.constant 0 : i32
    return %c0_i32, %arg1 : i32, i32
  }
  func.func @transform_4(%arg0: i32, %arg1: i32) -> (i32, i32) {
    %c0_i32 = arith.constant 0 : i32
    %c0_i32_0 = arith.constant 0 : i32
    return %c0_i32, %arg1 : i32, i32
  }
  func.func @transform_5(%arg0: i32, %arg1: i32) -> (i32, i32) {
    %c0_i32 = arith.constant 0 : i32
    return %arg0, %arg1 : i32, i32
  }
}

</mosaic_0001>

<bundles_post_ra>
// kernel: bottleneck_forward.3
= control target key start
LH: loop header
LB: loop body
LE: loop exit
PB: predicated region body
PF: predicated region fallthrough
CT: control target
= control target key end

     0   :  { %s1257_s12 = smov 0   ;;  %s1259_s13 = smov 0   ;;  %s1394_s0 = inlined_call_operand.vmem [shape: bf16[512,128], index: 0, kind: input, shape index: {}]   ;;  %s1395_s1 = inlined_call_operand.vmem [shape: bf16[128,128], index: 1, kind: input, shape index: {}]   ;;  %s1396_s2 = inlined_call_operand.vmem [shape: f32[1,128], index: 2, kind: input, shape index: {}]   ;;  %s1397_s3 = inlined_call_operand.vmem [shape: bf16[512,128], index: 3, kind: output, shape index: {}]  }
   0x1   :  { %s1261_s14 = smov 0  }
   0x2 LB: > { %s25_s15 = sadd.s32 1, %s1231_s13  ;;  %p886_p0 = scmp.ge.s32.totalorder %s1235_s14, 1  ;;  %s1235_s14 = sphi %s1261_s14, %s13_s14   ;;  %s1231_s13 = sphi %s1259_s13, %s1399_s13   ;;  %s1227_s12 = sphi %s1257_s12, %s1398_s12  }
   0x3   : > { %p27_p1 = scmp.ge.s32.totalorder %s25_s15, 2  ;;  %p169_p2 = scmp.lt.s32.totalorder %s1235_s14, 3 }
   0x5   : > { %s1401_s15 = smov (%p27_p1, %s25_s15), 0  ;;  %p170_p3 = pnand %p886_p0, %p169_p2 }
   0x6   : > { %s887_s18 = sshll.u32 (!%p170_p3), %s1227_s12, 5 }
   0x7   : > { %173 = sbr.rel (%p170_p3) target bundleno = 275 (0x113), region = 32  ;;  %p204_p4 = scmp.lt.s32.totalorder (!%p170_p3), %s887_s18, 63 }
   0xc   : > { %v1189_v0 = vld [vmem:[%s1395_s1 + $0x38] sm:$0xff]   ;;  %v1190_v1 = vld [vmem:[%s1395_s1 + $0x30] sm:$0xff]   ;;  %s1403_s18 = smov (!%p204_p4, %s887_s18), 63  ;;  %v1191_v2 = vld [vmem:[%s1395_s1 + $0x28] sm:$0xff]  }
   0xd   : > { %1101 = vmatprep.subr.bf16.mxu0 %v1189_v0  ;;  %1149 = vmatprep.subr.bf16.mxu1 %v1189_v0  ;;  %s888_s23 = sshll.u32 %s1403_s18, 2  ;;  %v1192_v3 = vld [vmem:[%s1395_s1 + $0x20] sm:$0xff]   ;;  %v1193_v6 = vld [vmem:[%s1395_s1 + $0x18] sm:$0xff]   ;;  %v1194_v7 = vld [vmem:[%s1395_s1 + $0x10] sm:$0xff]  }
   0xe   : > { %1102 = vmatpush3.bf16.msra.mxu0 %v1189_v0  ;;  %1157 = vmatpush3.bf16.msra.mxu1 %v1189_v0  ;;  %s1292_s26 = scalar_lea.vmem %s1394_s0, %s888_s23  ;;  %v1195_v8 = vld [vmem:[%s1395_s1 + $0x8] sm:$0xff]   ;;  %v1196_v9 = vld [vmem:[%s1395_s1] sm:$0xff]   ;;  %s1343_s17 = scalar_lea.vmem %s1397_s3, %s888_s23 }
   0xf   : > { %1103 = vmatprep.subr.bf16.mxu0 %v1190_v1  ;;  %1150 = vmatprep.subr.bf16.mxu1 %v1190_v1  ;;  %v1197_v4 = vld [vmem:[%s1292_s26] sm:$0xff]   ;;  %v1199_v10 = vld [vmem:[%s1292_s26 + $0x8] sm:$0xff]   ;;  %v1201_v12 = vld [vmem:[%s1292_s26 + $0x10] sm:$0xff]  }
  0x10   : > { %v1198_v5 = vld [vmem:[%s1292_s26 + $0x40] sm:$0xff]   ;;  %1117 = vmatprep.mubr.bf16.mxu0 %v1197_v4  ;;  %v1200_v11 = vld [vmem:[%s1292_s26 + $0x48] sm:$0xff]   ;;  %v1202_v13 = vld [vmem:[%s1292_s26 + $0x50] sm:$0xff]  }
  0x11   : > { %1133 = vmatprep.mubr.bf16.mxu1 %v1198_v5  ;;  %v1203_v14 = vld [vmem:[%s1292_s26 + $0x18] sm:$0xff]   ;;  %v1205_v16 = vld [vmem:[%s1292_s26 + $0x20] sm:$0xff]   ;;  %v1207_v18 = vld [vmem:[%s1292_s26 + $0x28] sm:$0xff]  }
  0x12   : > { %1104 = vmatpush3.bf16.msra.mxu0 %v1190_v1  ;;  %1158 = vmatpush3.bf16.msra.mxu1 %v1190_v1  ;;  %v1204_v15 = vld [vmem:[%s1292_s26 + $0x58] sm:$0xff]   ;;  %v1206_v17 = vld [vmem:[%s1292_s26 + $0x60] sm:$0xff]   ;;  %v1208_v19 = vld [vmem:[%s1292_s26 + $0x68] sm:$0xff]  }
  0x13   : > { %1105 = vmatprep.subr.bf16.mxu0 %v1191_v2  ;;  %1151 = vmatprep.subr.bf16.mxu1 %v1191_v2  ;;  %v1209_v20 = vld [vmem:[%s1292_s26 + $0x30] sm:$0xff]   ;;  %v1211_v22 = vld [vmem:[%s1292_s26 + $0x38] sm:$0xff]   ;;  %v1328_v24 = vld [vmem:[%s1396_s2] ss:$0 sm:$0xff] }
  0x14   : > { %v1210_v21 = vld [vmem:[%s1292_s26 + $0x70] sm:$0xff]   ;;  %v1212_v23 = vld [vmem:[%s1292_s26 + $0x78] sm:$0xff]  }
  0x16   : > { %1106 = vmatpush3.bf16.msra.mxu0 %v1191_v2  ;;  %1159 = vmatpush3.bf16.msra.mxu1 %v1191_v2 }
  0x17   : > { %1107 = vmatprep.subr.bf16.mxu0 %v1192_v3  ;;  %1152 = vmatprep.subr.bf16.mxu1 %v1192_v3 }
  0x1a   : > { %1108 = vmatpush3.bf16.msra.mxu0 %v1192_v3  ;;  %1160 = vmatpush3.bf16.msra.mxu1 %v1192_v3 }
  0x1b   : > { %1109 = vmatprep.subr.bf16.mxu0 %v1193_v6  ;;  %1153 = vmatprep.subr.bf16.mxu1 %v1193_v6 }
  0x1e   : > { %1110 = vmatpush3.bf16.msra.mxu0 %v1193_v6  ;;  %1161 = vmatpush3.bf16.msra.mxu1 %v1193_v6 }
  0x1f   : > { %1111 = vmatprep.subr.bf16.mxu0 %v1194_v7  ;;  %1154 = vmatprep.subr.bf16.mxu1 %v1194_v7 }
  0x22   : > { %1112 = vmatpush3.bf16.msra.mxu0 %v1194_v7  ;;  %1162 = vmatpush3.bf16.msra.mxu1 %v1194_v7 }
  0x23   : > { %1113 = vmatprep.subr.bf16.mxu0 %v1195_v8  ;;  %1155 = vmatprep.subr.bf16.mxu1 %v1195_v8 }
  0x26   : > { %1114 = vmatpush3.bf16.msra.mxu0 %v1195_v8  ;;  %1163 = vmatpush3.bf16.msra.mxu1 %v1195_v8 }
  0x27   : > { %1115 = vmatprep.subr.bf16.mxu0 %v1196_v9  ;;  %1156 = vmatprep.subr.bf16.mxu1 %v1196_v9 }
  0x2a   : > { %1116 = vmatpush3.bf16.msra.mxu0 %v1196_v9  ;;  %1164 = vmatpush3.bf16.msra.mxu1 %v1196_v9 }
  0x2d   : > { %1118 = vmatmul.mubr.bf16.vlgmr.msra.gmra.mxu0 %v1199_v10  ;;  %1134 = vmatmul.mubr.bf16.vlgmr.msra.gmra.mxu1 %v1200_v11 }
  0x2e   : > { %1121 = vmatprep.mubr.bf16.mxu0 %v1201_v12  ;;  %1137 = vmatprep.mubr.bf16.mxu1 %v1202_v13 }
  0x35   : > { %1122 = vmatmul.mubr.bf16.gmra.mxu0 %v1203_v14  ;;  %1138 = vmatmul.mubr.bf16.gmra.mxu1 %v1204_v15 }
  0x36   : > { %1125 = vmatprep.mubr.bf16.mxu0 %v1205_v16  ;;  %1141 = vmatprep.mubr.bf16.mxu1 %v1206_v17 }
  0x3d   : > { %1126 = vmatmul.mubr.bf16.gmra.mxu0 %v1207_v18  ;;  %1142 = vmatmul.mubr.bf16.gmra.mxu1 %v1208_v19 }
  0x3e   : > { %1129 = vmatprep.mubr.bf16.mxu0 %v1209_v20  ;;  %1145 = vmatprep.mubr.bf16.mxu1 %v1210_v21 }
  0x45   : > { %1130 = vmatmul.mubr.bf16.gmra.mxu0 %v1211_v22  ;;  %1146 = vmatmul.mubr.bf16.gmra.mxu1 %v1212_v23 }
  0xed   : > { %v1119_v25 = vpop.f32.mrf.mxu0  ;;  %v1135_v26 = vpop.f32.mrf.mxu1 }
  0xee   : > { %v468_v27 = vadd.f32 %v1119_v25, %v1328_v24  ;;  %v532_v28 = vadd.f32 %v1135_v26, %v1328_v24 }
  0xef   : > { %v459_v29 = vpop.f32.mrf.mxu0  ;;  %v523_v30 = vpop.f32.mrf.mxu1 }
  0xf0   : > { %v460_v31 = vadd.f32 %v1328_v24, %v459_v29  ;;  %v524_v32 = vadd.f32 %v1328_v24, %v523_v30  ;;  %v588_v37 = vmax.f32 %v468_v27, 0.0  ;;  %v604_v38 = vmax.f32 %v532_v28, 0.0 }
  0xf1   : > { %v1120_v33 = vpop.f32.mrf.mxu0  ;;  %v1136_v34 = vpop.f32.mrf.mxu1 }
  0xf2   : > { %v471_v35 = vadd.f32 %v1120_v33, %v1328_v24  ;;  %v535_v36 = vadd.f32 %v1136_v34, %v1328_v24  ;;  %v586_v45 = vmax.f32 %v460_v31, 0.0  ;;  %v602_v46 = vmax.f32 %v524_v32, 0.0 }
  0xf3   : > { %v462_v39 = vpop.f32.mrf.mxu0  ;;  %v526_v40 = vpop.f32.mrf.mxu1 }
  0xf4   : > { %v589_v41 = vmax.f32 %v471_v35, 0.0  ;;  %v605_v42 = vmax.f32 %v535_v36, 0.0  ;;  %v463_v43 = vadd.f32 %v1328_v24, %v462_v39  ;;  %v527_v44 = vadd.f32 %v1328_v24, %v526_v40 }
  0xf5   : > { %v1123_v47 = vpop.f32.mrf.mxu0  ;;  %v1139_v48 = vpop.f32.mrf.mxu1 }
  0xf6   : > { %v990_v49 = vpack.c.bf16 %v589_v41, %v588_v37  ;;  %v1030_v50 = vpack.c.bf16 %v605_v42, %v604_v38  ;;  %v587_v51 = vmax.f32 %v463_v43, 0.0  ;;  %v603_v52 = vmax.f32 %v527_v44, 0.0 }
  0xf7   : > { %v484_v53 = vadd.f32 %v1123_v47, %v1328_v24  ;;  %v548_v54 = vadd.f32 %v1139_v48, %v1328_v24  ;;  %v475_v55 = vpop.f32.mrf.mxu0  ;;  %v539_v56 = vpop.f32.mrf.mxu1 }
  0xf8   : > { %1062 = vst [vmem:[%s1343_s17 + $0x8] sm:$0xff] %v990_v49   ;;  %1070 = vst [vmem:[%s1343_s17 + $0x48] sm:$0xff] %v1030_v50   ;;  %v985_v57 = vpack.c.bf16 %v587_v51, %v586_v45  ;;  %v1025_v58 = vpack.c.bf16 %v603_v52, %v602_v46  ;;  %v476_v59 = vadd.f32 %v1328_v24, %v475_v55 }
  0xf9   : > { %v540_v60 = vadd.f32 %v1328_v24, %v539_v56  ;;  %v1124_v61 = vpop.f32.mrf.mxu0  ;;  %v1140_v62 = vpop.f32.mrf.mxu1  ;;  %v592_v1 = vmax.f32 %v484_v53, 0.0  ;;  %v608_v2 = vmax.f32 %v548_v54, 0.0 }
  0xfa   : > { %986 = vst [vmem:[%s1343_s17] sm:$0xff] %v985_v57   ;;  %1069 = vst [vmem:[%s1343_s17 + $0x40] sm:$0xff] %v1025_v58   ;;  %v487_v63 = vadd.f32 %v1124_v61, %v1328_v24  ;;  %v551_v0 = vadd.f32 %v1140_v62, %v1328_v24  ;;  %v590_v9 = vmax.f32 %v476_v59, 0.0 }
  0xfb   : > { %v478_v3 = vpop.f32.mrf.mxu0  ;;  %v542_v4 = vpop.f32.mrf.mxu1  ;;  %v606_v10 = vmax.f32 %v540_v60, 0.0 }
  0xfc   : > { %v593_v5 = vmax.f32 %v487_v63, 0.0  ;;  %v609_v6 = vmax.f32 %v551_v0, 0.0  ;;  %v479_v7 = vadd.f32 %v1328_v24, %v478_v3  ;;  %v543_v8 = vadd.f32 %v1328_v24, %v542_v4 }
  0xfd   : > { %v1127_v11 = vpop.f32.mrf.mxu0  ;;  %v1143_v12 = vpop.f32.mrf.mxu1 }
  0xfe   : > { %v1000_v13 = vpack.c.bf16 %v593_v5, %v592_v1  ;;  %v1040_v14 = vpack.c.bf16 %v609_v6, %v608_v2  ;;  %v591_v15 = vmax.f32 %v479_v7, 0.0  ;;  %v607_v16 = vmax.f32 %v543_v8, 0.0 }
  0xff   : > { %v500_v17 = vadd.f32 %v1127_v11, %v1328_v24  ;;  %v564_v18 = vadd.f32 %v1143_v12, %v1328_v24  ;;  %v491_v19 = vpop.f32.mrf.mxu0  ;;  %v555_v20 = vpop.f32.mrf.mxu1 }
 0x100   : > { %1064 = vst [vmem:[%s1343_s17 + $0x18] sm:$0xff] %v1000_v13   ;;  %1072 = vst [vmem:[%s1343_s17 + $0x58] sm:$0xff] %v1040_v14   ;;  %v995_v21 = vpack.c.bf16 %v591_v15, %v590_v9  ;;  %v1035_v22 = vpack.c.bf16 %v607_v16, %v606_v10  ;;  %v492_v23 = vadd.f32 %v1328_v24, %v491_v19 }
 0x101   : > { %v556_v25 = vadd.f32 %v1328_v24, %v555_v20  ;;  %v1128_v26 = vpop.f32.mrf.mxu0  ;;  %v1144_v27 = vpop.f32.mrf.mxu1  ;;  %v596_v30 = vmax.f32 %v500_v17, 0.0  ;;  %v612_v31 = vmax.f32 %v564_v18, 0.0 }
 0x102   : > { %1063 = vst [vmem:[%s1343_s17 + $0x10] sm:$0xff] %v995_v21   ;;  %1071 = vst [vmem:[%s1343_s17 + $0x50] sm:$0xff] %v1035_v22   ;;  %v503_v28 = vadd.f32 %v1128_v26, %v1328_v24  ;;  %v567_v29 = vadd.f32 %v1144_v27, %v1328_v24  ;;  %v594_v38 = vmax.f32 %v492_v23, 0.0 }
 0x103   : > { %v494_v32 = vpop.f32.mrf.mxu0  ;;  %v558_v33 = vpop.f32.mrf.mxu1  ;;  %v610_v39 = vmax.f32 %v556_v25, 0.0 }
 0x104   : > { %v597_v34 = vmax.f32 %v503_v28, 0.0  ;;  %v613_v35 = vmax.f32 %v567_v29, 0.0  ;;  %v495_v36 = vadd.f32 %v1328_v24, %v494_v32  ;;  %v559_v37 = vadd.f32 %v1328_v24, %v558_v33 }
 0x105   : > { %v1131_v40 = vpop.f32.mrf.mxu0  ;;  %v1147_v41 = vpop.f32.mrf.mxu1 }
 0x106   : > { %v1010_v42 = vpack.c.bf16 %v597_v34, %v596_v30  ;;  %v1050_v43 = vpack.c.bf16 %v613_v35, %v612_v31  ;;  %v595_v44 = vmax.f32 %v495_v36, 0.0  ;;  %v611_v45 = vmax.f32 %v559_v37, 0.0 }
 0x107   : > { %v516_v46 = vadd.f32 %v1131_v40, %v1328_v24  ;;  %v580_v47 = vadd.f32 %v1147_v41, %v1328_v24  ;;  %v507_v48 = vpop.f32.mrf.mxu0  ;;  %v571_v49 = vpop.f32.mrf.mxu1 }
 0x108   : > { %1066 = vst [vmem:[%s1343_s17 + $0x28] sm:$0xff] %v1010_v42   ;;  %1074 = vst [vmem:[%s1343_s17 + $0x68] sm:$0xff] %v1050_v43   ;;  %v1005_v50 = vpack.c.bf16 %v595_v44, %v594_v38  ;;  %v1045_v51 = vpack.c.bf16 %v611_v45, %v610_v39  ;;  %v508_v52 = vadd.f32 %v1328_v24, %v507_v48 }
 0x109   : > { %v572_v53 = vadd.f32 %v1328_v24, %v571_v49  ;;  %v1132_v54 = vpop.f32.mrf.mxu0  ;;  %v1148_v55 = vpop.f32.mrf.mxu1  ;;  %v600_v58 = vmax.f32 %v516_v46, 0.0  ;;  %v616_v59 = vmax.f32 %v580_v47, 0.0 }
 0x10a   : > { %1065 = vst [vmem:[%s1343_s17 + $0x20] sm:$0xff] %v1005_v50   ;;  %1073 = vst [vmem:[%s1343_s17 + $0x60] sm:$0xff] %v1045_v51   ;;  %v519_v56 = vadd.f32 %v1132_v54, %v1328_v24  ;;  %v583_v57 = vadd.f32 %v1148_v55, %v1328_v24  ;;  %v598_v2 = vmax.f32 %v508_v52, 0.0 }
 0x10b   : > { %v510_v60 = vpop.f32.mrf.mxu0  ;;  %v574_v61 = vpop.f32.mrf.mxu1  ;;  %v614_v3 = vmax.f32 %v572_v53, 0.0 }
 0x10c   : > { %v601_v62 = vmax.f32 %v519_v56, 0.0  ;;  %v617_v63 = vmax.f32 %v583_v57, 0.0  ;;  %v511_v0 = vadd.f32 %v1328_v24, %v510_v60  ;;  %v575_v1 = vadd.f32 %v1328_v24, %v574_v61 }
 0x10e   : > { %v1020_v4 = vpack.c.bf16 %v601_v62, %v600_v58  ;;  %v1060_v5 = vpack.c.bf16 %v617_v63, %v616_v59  ;;  %v599_v6 = vmax.f32 %v511_v0, 0.0  ;;  %v615_v7 = vmax.f32 %v575_v1, 0.0 }
 0x110   : > { %1068 = vst [vmem:[%s1343_s17 + $0x38] sm:$0xff] %v1020_v4   ;;  %1076 = vst [vmem:[%s1343_s17 + $0x78] sm:$0xff] %v1060_v5   ;;  %v1015_v8 = vpack.c.bf16 %v599_v6, %v598_v2  ;;  %v1055_v9 = vpack.c.bf16 %v615_v7, %v614_v3 }
 0x112   : > { %1067 = vst [vmem:[%s1343_s17 + $0x30] sm:$0xff] %v1015_v8   ;;  %1075 = vst [vmem:[%s1343_s17 + $0x70] sm:$0xff] %v1055_v9  }
 0x113 PF: > { %s13_s14 = sadd.s32 1, %s1235_s14   ;;  %s1398_s12 = smov %s1231_s13 }
 0x114   : > { %p10_p5 = scmp.ge.s32.totalorder %s13_s14, 4   ;;  %s1399_s13 = smov %s1401_s15 }
 0x116   :  { %12 = sbr.rel (!%p10_p5) target bundleno = 2 (0x2), region = 68 }

// kernel: bottleneck_forward.4
= control target key start
LH: loop header
LB: loop body
LE: loop exit
PB: predicated region body
PF: predicated region fallthrough
CT: control target
= control target key end

     0   :  { %s3067_s12 = smov 0   ;;  %s3069_s13 = smov 0   ;;  %s3468_s0 = inlined_call_operand.vmem [shape: bf16[3,2,2,72,128], index: 0, kind: input, shape index: {}]   ;;  %s3469_s1 = inlined_call_operand.vmem [shape: bf16[9,128,128], index: 1, kind: input, shape index: {}]   ;;  %s3470_s2 = inlined_call_operand.vmem [shape: f32[1,128], index: 2, kind: input, shape index: {}]   ;;  %s3471_s3 = inlined_call_operand.vmem [shape: bf16[2,64,128], index: 3, kind: output, shape index: {}]  }
   0x1   :  { %s3071_s14 = smov 0   ;;  %s3073_s15 = smov 0  }
   0x2   :  { %s3075_s16 = smov 0  }
   0x3 LB: > { %s25_s17 = sadd.s32 1, %s3041_s15  ;;  %p39_p1 = scmp.ne.s32.totalorder %s3033_s13, %s3029_s12  ;;  %s3045_s16 = sphi %s3075_s16, %s13_s16   ;;  %s3041_s15 = sphi %s3073_s15, %s3483_s15   ;;  %s3037_s14 = sphi %s3071_s14, %s3482_s14   ;;  %s3033_s13 = sphi %s3069_s13, %s3481_s13   ;;  %s3029_s12 = sphi %s3067_s12, %s3480_s12  }
   0x4   : > { %p27_p0 = scmp.ge.s32.totalorder %s25_s17, 2  ;;  %p40_p2 = scmp.eq.s32.totalorder %s3045_s16, 0 }
   0x5   : > { %s32_s19 = sadd.s32 1, %s3033_s13  ;;  %p2176_p5 = scmp.ge.s32.totalorder %s3045_s16, 2 }
   0x6   : > { %s3485_s17 = smov (%p27_p0, %s25_s17), 0  ;;  %p41_p3 = por %p40_p2, %p39_p1 }
   0x7   : > { %s29_s18 = ssub.s32 %s3041_s15, %s3485_s17  ;;  %158 = sbr.rel (%p2176_p5) target bundleno = 32 (0x20), region = 24 }
   0x8   : > { %p30_p4 = scmp.eq.s32.totalorder %s29_s18, 0 }
   0xa   : > { %s3102_s20 = scalar_select %p30_p4, %s3033_s13, %s32_s19  }
   0xc   : > { %161 = sbr.rel (!%p41_p3) target bundleno = 32 (0x20), region = 28  ;;  %s163_s21 = sand.u32 (%p41_p3), 1, %s3033_s13  }
   0xd   : > { %s2857_s22 = smul.u32 (%p41_p3), 36, %s3041_s15 }
   0xe   : > { %s2856_s23 = smul.u32 (%p41_p3), 216, %s163_s21 }
   0xf   : > { %s3110_s26 = scalar_lea.vmem (%p41_p3), %s3468_s0, %s2857_s22 }
  0x10   : > { %v185_v0 = vld [vmem:[%s3110_s26] sm:$0xff] (%p41_p3)   ;;  %v189_v1 = vld [vmem:[%s3110_s26 + $0x8] sm:$0xff] (%p41_p3)   ;;  %v193_v2 = vld [vmem:[%s3110_s26 + $0x10] sm:$0xff] (%p41_p3)   ;;  %s3115_s27 = scalar_lea.vmem (%p41_p3), [#allocation2], %s2856_s23 }
  0x11   : > { %186 = vst [vmem:[%s3115_s27] sm:$0xff] %v185_v0   ;;  %190 = vst [vmem:[%s3115_s27 + $0x8] sm:$0xff] %v189_v1   ;;  %v197_v3 = vld [vmem:[%s3110_s26 + $0x18] sm:$0xff]   ;;  %v201_v4 = vld [vmem:[%s3110_s26 + $0x20] sm:$0xf] }
  0x12   : > { %194 = vst [vmem:[%s3115_s27 + $0x10] sm:$0xff] %v193_v2   ;;  %v203_v5 = vld [vmem:[%s3110_s26 + $0x48] sm:$0xff]   ;;  %198 = vst [vmem:[%s3115_s27 + $0x18] sm:$0xff] %v197_v3   ;;  %v207_v6 = vld [vmem:[%s3110_s26 + $0x50] sm:$0xff]  }
  0x13   : > { %202 = vst [vmem:[%s3115_s27 + $0x20] sm:$0xf] %v201_v4  ;;  %204 = vst [vmem:[%s3115_s27 + $0x24] sm:$0xff] %v203_v5   ;;  %v211_v7 = vld [vmem:[%s3110_s26 + $0x58] sm:$0xff]   ;;  %v215_v8 = vld [vmem:[%s3110_s26 + $0x60] sm:$0xff]  }
  0x14   : > { %208 = vst [vmem:[%s3115_s27 + $0x2c] sm:$0xff] %v207_v6   ;;  %212 = vst [vmem:[%s3115_s27 + $0x34] sm:$0xff] %v211_v7   ;;  %v219_v9 = vld [vmem:[%s3110_s26 + $0x68] sm:$0xf]  ;;  %v221_v10 = vld [vmem:[%s3110_s26 + $0x90] sm:$0xff]  }
  0x15   : > { %216 = vst [vmem:[%s3115_s27 + $0x3c] sm:$0xff] %v215_v8   ;;  %v225_v11 = vld [vmem:[%s3110_s26 + $0x98] sm:$0xff]   ;;  %220 = vst [vmem:[%s3115_s27 + $0x44] sm:$0xf] %v219_v9  ;;  %v229_v12 = vld [vmem:[%s3110_s26 + $0xa0] sm:$0xff]  }
  0x16   : > { %222 = vst [vmem:[%s3115_s27 + $0x48] sm:$0xff] %v221_v10   ;;  %226 = vst [vmem:[%s3115_s27 + $0x50] sm:$0xff] %v225_v11   ;;  %v233_v13 = vld [vmem:[%s3110_s26 + $0xa8] sm:$0xff]   ;;  %v237_v14 = vld [vmem:[%s3110_s26 + $0xb0] sm:$0xf] }
  0x17   : > { %230 = vst [vmem:[%s3115_s27 + $0x58] sm:$0xff] %v229_v12   ;;  %234 = vst [vmem:[%s3115_s27 + $0x60] sm:$0xff] %v233_v13   ;;  %v239_v15 = vld [vmem:[%s3110_s26 + $0xd8] sm:$0xff]   ;;  %v243_v16 = vld [vmem:[%s3110_s26 + $0xe0] sm:$0xff]  }
  0x18   : > { %238 = vst [vmem:[%s3115_s27 + $0x68] sm:$0xf] %v237_v14  ;;  %v247_v17 = vld [vmem:[%s3110_s26 + $0xe8] sm:$0xff]   ;;  %240 = vst [vmem:[%s3115_s27 + $0x6c] sm:$0xff] %v239_v15   ;;  %v251_v18 = vld [vmem:[%s3110_s26 + $0xf0] sm:$0xff]  }
  0x19   : > { %244 = vst [vmem:[%s3115_s27 + $0x74] sm:$0xff] %v243_v16   ;;  %248 = vst [vmem:[%s3115_s27 + $0x7c] sm:$0xff] %v247_v17   ;;  %v255_v19 = vld [vmem:[%s3110_s26 + $0xf8] sm:$0xf]  ;;  %v257_v20 = vld [vmem:[%s3110_s26 + $0x120] sm:$0xff]  }
  0x1a   : > { %252 = vst [vmem:[%s3115_s27 + $0x84] sm:$0xff] %v251_v18   ;;  %256 = vst [vmem:[%s3115_s27 + $0x8c] sm:$0xf] %v255_v19  ;;  %v261_v21 = vld [vmem:[%s3110_s26 + $0x128] sm:$0xff]   ;;  %v265_v22 = vld [vmem:[%s3110_s26 + $0x130] sm:$0xff]  }
  0x1b   : > { %258 = vst [vmem:[%s3115_s27 + $0x90] sm:$0xff] %v257_v20   ;;  %v269_v23 = vld [vmem:[%s3110_s26 + $0x138] sm:$0xff]   ;;  %262 = vst [vmem:[%s3115_s27 + $0x98] sm:$0xff] %v261_v21   ;;  %v273_v24 = vld [vmem:[%s3110_s26 + $0x140] sm:$0xf] }
  0x1c   : > { %266 = vst [vmem:[%s3115_s27 + $0xa0] sm:$0xff] %v265_v22   ;;  %270 = vst [vmem:[%s3115_s27 + $0xa8] sm:$0xff] %v269_v23   ;;  %v275_v25 = vld [vmem:[%s3110_s26 + $0x168] sm:$0xff]   ;;  %v279_v26 = vld [vmem:[%s3110_s26 + $0x170] sm:$0xff]  }
  0x1d   : > { %274 = vst [vmem:[%s3115_s27 + $0xb0] sm:$0xf] %v273_v24  ;;  %276 = vst [vmem:[%s3115_s27 + $0xb4] sm:$0xff] %v275_v25   ;;  %v283_v27 = vld [vmem:[%s3110_s26 + $0x178] sm:$0xff]   ;;  %v287_v28 = vld [vmem:[%s3110_s26 + $0x180] sm:$0xff]  }
  0x1e   : > { %280 = vst [vmem:[%s3115_s27 + $0xbc] sm:$0xff] %v279_v26   ;;  %v291_v29 = vld [vmem:[%s3110_s26 + $0x188] sm:$0xf]  ;;  %284 = vst [vmem:[%s3115_s27 + $0xc4] sm:$0xff] %v283_v27  }
  0x1f   : > { %288 = vst [vmem:[%s3115_s27 + $0xcc] sm:$0xff] %v287_v28   ;;  %292 = vst [vmem:[%s3115_s27 + $0xd4] sm:$0xf] %v291_v29 }
  0x20 PF: > { %p2178_p6 = scmp.ge.s32.totalorder %s3045_s16, 1  ;;  %p423_p7 = scmp.lt.s32.totalorder %s3045_s16, 3 }
  0x22   : > { %p424_p8 = pnand %p2178_p6, %p423_p7 }
  0x24   : > { %427 = sbr.rel (%p424_p8) target bundleno = 411 (0x19b), region = 69 }
  0x29   : > { %v2899_v30 = vld [vmem:[%s3469_s1 + $0x78] sm:$0xff]   ;;  %v2901_v32 = vld [vmem:[%s3469_s1 + $0x70] sm:$0xff]   ;;  %v2903_v34 = vld [vmem:[%s3469_s1 + $0x68] sm:$0xff]   ;;  %s430_s19 = sand.u32 1, %s3029_s12   ;;  %p470_p9 = scmp.lt.s32.totalorder %s3037_s14, 1 }
  0x2a   : > { %v2900_v31 = vld [vmem:[%s3469_s1 + $0x38] sm:$0xff]   ;;  %2624 = vmatprep.subr.bf16.mxu0 %v2899_v30  ;;  %v2902_v33 = vld [vmem:[%s3469_s1 + $0x30] sm:$0xff]   ;;  %v2904_v35 = vld [vmem:[%s3469_s1 + $0x28] sm:$0xff]   ;;  %s2858_s25 = smul.u32 216, %s430_s19 }
  0x2b   : > { %2648 = vmatprep.subr.bf16.mxu1 %v2900_v31  ;;  %2625 = vmatpush3.bf16.msra.mxu0 %v2899_v30  ;;  %v2905_v36 = vld [vmem:[%s3469_s1 + $0x60] sm:$0xff]   ;;  %v2907_v38 = vld [vmem:[%s3469_s1 + $0x58] sm:$0xff]   ;;  %v2909_v40 = vld [vmem:[%s3469_s1 + $0x50] sm:$0xff]   ;;  %s3487_s14 = smov (!%p470_p9, %s3037_s14), 1 }
  0x2c   : > { %2649 = vmatpush3.bf16.msra.mxu1 %v2900_v31  ;;  %2626 = vmatprep.subr.bf16.mxu0 %v2901_v32  ;;  %v2906_v37 = vld [vmem:[%s3469_s1 + $0x20] sm:$0xff]   ;;  %v2908_v39 = vld [vmem:[%s3469_s1 + $0x18] sm:$0xff]   ;;  %v2910_v41 = vld [vmem:[%s3469_s1 + $0x10] sm:$0xff]   ;;  %s3213_s6 = scalar_lea.vmem [#allocation2], %s2858_s25  ;;  %s2484_s8 = sshll.u32 %s3487_s14, 5 }
  0x2d   : > { %2650 = vmatprep.subr.bf16.mxu1 %v2902_v33  ;;  %v2915_v42 = vld [vmem:[%s3213_s6 + $0x48] sm:$0xff]   ;;  %v2916_v43 = vld [vmem:[%s3213_s6] sm:$0xff]   ;;  %v2917_v48 = vld [vmem:[%s3213_s6 + $0x50] sm:$0xff]   ;;  %s477_s11 = scalar_lea.vmem %s3471_s3, %s2484_s8 }
  0x2e   : > { %2640 = vmatprep.mubr.bf16.mxu0 %v2915_v42  ;;  %2664 = vmatprep.mubr.bf16.mxu1 %v2916_v43  ;;  %v2911_v44 = vld [vmem:[%s3469_s1 + $0x48] sm:$0xff]   ;;  %v2913_v46 = vld [vmem:[%s3469_s1 + $0x40] sm:$0xff]   ;;  %v2919_v49 = vld [vmem:[%s3469_s1 + $0xb8] sm:$0xff]  }
  0x2f   : > { %2627 = vmatpush3.bf16.msra.mxu0 %v2901_v32  ;;  %v2912_v45 = vld [vmem:[%s3469_s1 + $0x8] sm:$0xff]   ;;  %v2914_v47 = vld [vmem:[%s3469_s1] sm:$0xff]   ;;  %v2920_v50 = vld [vmem:[%s3469_s1 + $0xf8] sm:$0xff]  }
  0x30   : > { %2651 = vmatpush3.bf16.msra.mxu1 %v2902_v33  ;;  %2628 = vmatprep.subr.bf16.mxu0 %v2903_v34  ;;  %v2918_v51 = vld [vmem:[%s3213_s6 + $0x8] sm:$0xff]   ;;  %v2921_v52 = vld [vmem:[%s3469_s1 + $0xb0] sm:$0xff]   ;;  %v2931_v59 = vld [vmem:[%s3213_s6 + $0x60] sm:$0xff]  }
  0x31   : > { %2652 = vmatprep.subr.bf16.mxu1 %v2904_v35  ;;  %v2922_v53 = vld [vmem:[%s3469_s1 + $0xf0] sm:$0xff]   ;;  %v2923_v56 = vld [vmem:[%s3469_s1 + $0xa8] sm:$0xff]   ;;  %v2925_v58 = vld [vmem:[%s3469_s1 + $0xa0] sm:$0xff]  }
  0x32   : > { %v2929_v54 = vld [vmem:[%s3213_s6 + $0x58] sm:$0xff]   ;;  %v2930_v55 = vld [vmem:[%s3213_s6 + $0x10] sm:$0xff]   ;;  %v2926_v61 = vld [vmem:[%s3469_s1 + $0xe0] sm:$0xff]  }
  0x33   : > { %2629 = vmatpush3.bf16.msra.mxu0 %v2903_v34  ;;  %v2924_v57 = vld [vmem:[%s3469_s1 + $0xe8] sm:$0xff]   ;;  %v2932_v60 = vld [vmem:[%s3213_s6 + $0x18] sm:$0xff]   ;;  %v2937_v6 = vld [vmem:[%s3469_s1 + $0x80] sm:$0xff]  }
  0x34   : > { %2653 = vmatpush3.bf16.msra.mxu1 %v2904_v35  ;;  %2630 = vmatprep.subr.bf16.mxu0 %v2905_v36  ;;  %v2939_v62 = vld [vmem:[%s3213_s6 + $0x90] sm:$0xff]   ;;  %v2940_v63 = vld [vmem:[%s3213_s6 + $0x24] sm:$0xff]   ;;  %v2941_v8 = vld [vmem:[%s3213_s6 + $0x98] sm:$0xff]  }
  0x35   : > { %2654 = vmatprep.subr.bf16.mxu1 %v2906_v37  ;;  %v2927_v0 = vld [vmem:[%s3469_s1 + $0x98] sm:$0xff]   ;;  %v2933_v2 = vld [vmem:[%s3469_s1 + $0x90] sm:$0xff]   ;;  %v2935_v4 = vld [vmem:[%s3469_s1 + $0x88] sm:$0xff]  }
  0x36   : > { %v2928_v1 = vld [vmem:[%s3469_s1 + $0xd8] sm:$0xff]   ;;  %v2934_v3 = vld [vmem:[%s3469_s1 + $0xd0] sm:$0xff]   ;;  %v2936_v5 = vld [vmem:[%s3469_s1 + $0xc8] sm:$0xff]  }
  0x37   : > { %2631 = vmatpush3.bf16.msra.mxu0 %v2905_v36  ;;  %v2938_v7 = vld [vmem:[%s3469_s1 + $0xc0] sm:$0xff]   ;;  %v2943_v9 = vld [vmem:[%s3469_s1 + $0x138] sm:$0xff]   ;;  %v2945_v12 = vld [vmem:[%s3469_s1 + $0x130] sm:$0xff]  }
  0x38   : > { %2655 = vmatpush3.bf16.msra.mxu1 %v2906_v37  ;;  %2632 = vmatprep.subr.bf16.mxu0 %v2907_v38  ;;  %v2944_v10 = vld [vmem:[%s3469_s1 + $0x178] sm:$0xff]   ;;  %v2942_v11 = vld [vmem:[%s3213_s6 + $0x2c] sm:$0xff]  }
  0x39   : > { %2656 = vmatprep.subr.bf16.mxu1 %v2908_v39  ;;  %v2946_v13 = vld [vmem:[%s3469_s1 + $0x170] sm:$0xff]   ;;  %v2947_v14 = vld [vmem:[%s3213_s6 + $0xa0] sm:$0xff]   ;;  %v2948_v16 = vld [vmem:[%s3213_s6 + $0xa8] sm:$0xff]  }
  0x3a   : > { %v2951_v15 = vld [vmem:[%s3213_s6 + $0x34] sm:$0xff]   ;;  %v2952_v19 = vld [vmem:[%s3213_s6 + $0x3c] sm:$0xff]   ;;  %v2963_v22 = vld [vmem:[%s3213_s6 + $0x6c] sm:$0xff]  }
  0x3b   : > { %2633 = vmatpush3.bf16.msra.mxu0 %v2907_v38  ;;  %v2949_v17 = vld [vmem:[%s3469_s1 + $0x128] sm:$0xff]   ;;  %v2953_v20 = vld [vmem:[%s3469_s1 + $0x120] sm:$0xff]   ;;  %v2955_v24 = vld [vmem:[%s3469_s1 + $0x118] sm:$0xff]  }
  0x3c   : > { %2657 = vmatpush3.bf16.msra.mxu1 %v2908_v39  ;;  %2634 = vmatprep.subr.bf16.mxu0 %v2909_v40  ;;  %v2950_v18 = vld [vmem:[%s3469_s1 + $0x168] sm:$0xff]   ;;  %v2954_v21 = vld [vmem:[%s3469_s1 + $0x160] sm:$0xff]   ;;  %v2956_v25 = vld [vmem:[%s3469_s1 + $0x158] sm:$0xff]  }
  0x3d   : > { %2658 = vmatprep.subr.bf16.mxu1 %v2910_v41  ;;  %v2964_v23 = vld [vmem:[%s3213_s6 + $0xb4] sm:$0xff]   ;;  %v2961_v30 = vld [vmem:[%s3469_s1 + $0x100] sm:$0xff]  }
  0x3e   : > { %v2957_v26 = vld [vmem:[%s3469_s1 + $0x110] sm:$0xff]   ;;  %v2959_v28 = vld [vmem:[%s3469_s1 + $0x108] sm:$0xff]   ;;  %v2962_v31 = vld [vmem:[%s3469_s1 + $0x140] sm:$0xff]  }
  0x3f   : > { %2635 = vmatpush3.bf16.msra.mxu0 %v2909_v40  ;;  %v2958_v27 = vld [vmem:[%s3469_s1 + $0x150] sm:$0xff]   ;;  %v2960_v29 = vld [vmem:[%s3469_s1 + $0x148] sm:$0xff]   ;;  %v2967_v33 = vld [vmem:[%s3469_s1 + $0x1b8] sm:$0xff]  }
  0x40   : > { %2659 = vmatpush3.bf16.msra.mxu1 %v2910_v41  ;;  %2636 = vmatprep.subr.bf16.mxu0 %v2911_v44  ;;  %v2965_v32 = vld [vmem:[%s3213_s6 + $0x74] sm:$0xff]   ;;  %v2966_v35 = vld [vmem:[%s3213_s6 + $0xbc] sm:$0xff]   ;;  %v2975_v39 = vld [vmem:[%s3213_s6 + $0xc4] sm:$0xff]  }
  0x41   : > { %2660 = vmatprep.subr.bf16.mxu1 %v2912_v45  ;;  %v2968_v34 = vld [vmem:[%s3469_s1 + $0x1f8] sm:$0xff]   ;;  %v2969_v36 = vld [vmem:[%s3469_s1 + $0x1b0] sm:$0xff]   ;;  %v2973_v41 = vld [vmem:[%s3469_s1 + $0x1a8] sm:$0xff]  }
  0x42   : > { %v2970_v37 = vld [vmem:[%s3469_s1 + $0x1f0] sm:$0xff]   ;;  %v2972_v40 = vld [vmem:[%s3213_s6 + $0x84] sm:$0xff]  }
  0x43   : > { %2637 = vmatpush3.bf16.msra.mxu0 %v2911_v44  ;;  %v2971_v38 = vld [vmem:[%s3213_s6 + $0x7c] sm:$0xff]   ;;  %v2974_v42 = vld [vmem:[%s3469_s1 + $0x1e8] sm:$0xff]  }
  0x44   : > { %2661 = vmatpush3.bf16.msra.mxu1 %v2912_v45  ;;  %2638 = vmatprep.subr.bf16.mxu0 %v2913_v46  ;;  %v2976_v43 = vld [vmem:[%s3213_s6 + $0xcc] sm:$0xff]  }
  0x45   : > { %2662 = vmatprep.subr.bf16.mxu1 %v2914_v47  ;;  %v2977_v44 = vld [vmem:[%s3469_s1 + $0x1a0] sm:$0xff]  }
  0x46   : > { %v2978_v45 = vld [vmem:[%s3469_s1 + $0x1e0] sm:$0xff]  }
  0x47   : > { %2639 = vmatpush3.bf16.msra.mxu0 %v2913_v46  ;;  %v2987_v46 = vld [vmem:[%s3213_s6 + $0x4] sm:$0xff]  }
  0x48   : > { %2663 = vmatpush3.bf16.msra.mxu1 %v2914_v47  ;;  %2672 = vmatprep.subr.bf16.mxu0 %v2919_v49  ;;  %v2988_v47 = vld [vmem:[%s3213_s6 + $0x4c] sm:$0xff]  }
  0x49   : > { %2696 = vmatprep.subr.bf16.mxu1 %v2920_v50 }
  0x4a   : > { %2641 = vmatmul.mubr.bf16.vlgmr.msra.gmra.mxu0 %v2917_v48  ;;  %v2979_v48 = vld [vmem:[%s3469_s1 + $0x198] sm:$0xff]  }
  0x4b   : > { %2665 = vmatmul.mubr.bf16.vlgmr.msra.gmra.mxu1 %v2918_v51  ;;  %2673 = vmatpush3.bf16.msra.mxu0 %v2919_v49  ;;  %v2980_v49 = vld [vmem:[%s3469_s1 + $0x1d8] sm:$0xff]   ;;  %v2982_v51 = vld [vmem:[%s3469_s1 + $0x1d0] sm:$0xff]  }
  0x4c   : > { %2697 = vmatpush3.bf16.msra.mxu1 %v2920_v50  ;;  %2674 = vmatprep.subr.bf16.mxu0 %v2921_v52  ;;  %v2981_v50 = vld [vmem:[%s3469_s1 + $0x190] sm:$0xff]  }
  0x4d   : > { %2698 = vmatprep.subr.bf16.mxu1 %v2922_v53  ;;  %2644 = vmatprep.mubr.bf16.mxu0 %v2929_v54  ;;  %v2985_v54 = vld [vmem:[%s3469_s1 + $0x180] sm:$0xff]  }
  0x4e   : > { %2668 = vmatprep.mubr.bf16.mxu1 %v2930_v55  ;;  %v2986_v55 = vld [vmem:[%s3469_s1 + $0x1c0] sm:$0xff]  }
  0x4f   : > { %2675 = vmatpush3.bf16.msra.mxu0 %v2921_v52  ;;  %v2983_v52 = vld [vmem:[%s3469_s1 + $0x188] sm:$0xff]  }
  0x50   : > { %2699 = vmatpush3.bf16.msra.mxu1 %v2922_v53  ;;  %2676 = vmatprep.subr.bf16.mxu0 %v2923_v56  ;;  %v2984_v53 = vld [vmem:[%s3469_s1 + $0x1c8] sm:$0xff]  }
  0x51   : > { %2700 = vmatprep.subr.bf16.mxu1 %v2924_v57 }
  0x52   : > { %2645 = vmatmul.mubr.bf16.gmra.mxu0 %v2931_v59  ;;  %v2992_v59 = vld [vmem:[%s3469_s1 + $0x230] sm:$0xff]  }
  0x53   : > { %2677 = vmatpush3.bf16.msra.mxu0 %v2923_v56  ;;  %2669 = vmatmul.mubr.bf16.gmra.mxu1 %v2932_v60  ;;  %v2991_v56 = vld [vmem:[%s3469_s1 + $0x238] sm:$0xff]  }
  0x54   : > { %2701 = vmatpush3.bf16.msra.mxu1 %v2924_v57  ;;  %2678 = vmatprep.subr.bf16.mxu0 %v2925_v58  ;;  %v2989_v57 = vld [vmem:[%s3213_s6 + $0xc] sm:$0xff]   ;;  %v2993_v60 = vld [vmem:[%s3213_s6 + $0x14] sm:$0xff]  }
  0x55   : > { %2702 = vmatprep.subr.bf16.mxu1 %v2926_v61  ;;  %2688 = vmatprep.mubr.bf16.mxu0 %v2939_v62  ;;  %v2995_v62 = vld [vmem:[%s3469_s1 + $0x228] sm:$0xff]  }
  0x56   : > { %2712 = vmatprep.mubr.bf16.mxu1 %v2940_v63  ;;  %v2994_v63 = vld [vmem:[%s3213_s6 + $0x1c] sm:$0xff]  }
  0x57   : > { %2679 = vmatpush3.bf16.msra.mxu0 %v2925_v58  ;;  %v2990_v58 = vld [vmem:[%s3213_s6 + $0x54] sm:$0xff]  }
  0x58   : > { %2703 = vmatpush3.bf16.msra.mxu1 %v2926_v61  ;;  %2680 = vmatprep.subr.bf16.mxu0 %v2927_v0  ;;  %v2996_v61 = vld [vmem:[%s3213_s6 + $0x5c] sm:$0xff]  }
  0x59   : > { %2704 = vmatprep.subr.bf16.mxu1 %v2928_v1 }
  0x5b   : > { %2681 = vmatpush3.bf16.msra.mxu0 %v2927_v0  ;;  %v2997_v0 = vld [vmem:[%s3213_s6 + $0x64] sm:$0xff]  }
  0x5c   : > { %2705 = vmatpush3.bf16.msra.mxu1 %v2928_v1  ;;  %2682 = vmatprep.subr.bf16.mxu0 %v2933_v2  ;;  %v2998_v1 = vld [vmem:[%s3469_s1 + $0x220] sm:$0xff]  }
  0x5d   : > { %2706 = vmatprep.subr.bf16.mxu1 %v2934_v3 }
  0x5f   : > { %2683 = vmatpush3.bf16.msra.mxu0 %v2933_v2  ;;  %v3003_v2 = vld [vmem:[%s3213_s6 + $0x94] sm:$0xff]  }
  0x60   : > { %2707 = vmatpush3.bf16.msra.mxu1 %v2934_v3  ;;  %2684 = vmatprep.subr.bf16.mxu0 %v2935_v4  ;;  %v3004_v3 = vld [vmem:[%s3213_s6 + $0xa4] sm:$0xff]  }
  0x61   : > { %2708 = vmatprep.subr.bf16.mxu1 %v2936_v5 }
  0x63   : > { %2685 = vmatpush3.bf16.msra.mxu0 %v2935_v4  ;;  %v2999_v4 = vld [vmem:[%s3469_s1 + $0x218] sm:$0xff]  }
  0x64   : > { %2709 = vmatpush3.bf16.msra.mxu1 %v2936_v5  ;;  %2686 = vmatprep.subr.bf16.mxu0 %v2937_v6  ;;  %v3000_v5 = vld [vmem:[%s3469_s1 + $0x210] sm:$0xff]  }
  0x65   : > { %2710 = vmatprep.subr.bf16.mxu1 %v2938_v7 }
  0x67   : > { %2687 = vmatpush3.bf16.msra.mxu0 %v2937_v6  ;;  %v3001_v6 = vld [vmem:[%s3469_s1 + $0x208] sm:$0xff]  }
  0x68   : > { %2711 = vmatpush3.bf16.msra.mxu1 %v2938_v7  ;;  %2720 = vmatprep.subr.bf16.mxu0 %v2943_v9  ;;  %v3002_v7 = vld [vmem:[%s3469_s1 + $0x200] sm:$0xff]  }
  0x69   : > { %2744 = vmatprep.subr.bf16.mxu1 %v2944_v10 }
  0x6a   : > { %2689 = vmatmul.mubr.bf16.vlgmr.msra.gmra.mxu0 %v2941_v8  ;;  %v3005_v8 = vld [vmem:[%s3213_s6 + $0x9c] sm:$0xff]  }
  0x6b   : > { %2713 = vmatmul.mubr.bf16.vlgmr.msra.gmra.mxu1 %v2942_v11  ;;  %2721 = vmatpush3.bf16.msra.mxu0 %v2943_v9  ;;  %v3006_v9 = vld [vmem:[%s3213_s6 + $0xac] sm:$0xff]  }
  0x6c   : > { %2745 = vmatpush3.bf16.msra.mxu1 %v2944_v10  ;;  %2722 = vmatprep.subr.bf16.mxu0 %v2945_v12 }
  0x6d   : > { %2746 = vmatprep.subr.bf16.mxu1 %v2946_v13  ;;  %2692 = vmatprep.mubr.bf16.mxu0 %v2947_v14 }
  0x6e   : > { %2716 = vmatprep.mubr.bf16.mxu1 %v2951_v15 }
  0x6f   : > { %2723 = vmatpush3.bf16.msra.mxu0 %v2945_v12 }
  0x70   : > { %2747 = vmatpush3.bf16.msra.mxu1 %v2946_v13  ;;  %2724 = vmatprep.subr.bf16.mxu0 %v2949_v17 }
  0x71   : > { %2748 = vmatprep.subr.bf16.mxu1 %v2950_v18 }
  0x72   : > { %2693 = vmatmul.mubr.bf16.gmra.mxu0 %v2948_v16 }
  0x73   : > { %2725 = vmatpush3.bf16.msra.mxu0 %v2949_v17  ;;  %2717 = vmatmul.mubr.bf16.gmra.mxu1 %v2952_v19 }
  0x74   : > { %2749 = vmatpush3.bf16.msra.mxu1 %v2950_v18  ;;  %2726 = vmatprep.subr.bf16.mxu0 %v2953_v20 }
  0x75   : > { %2750 = vmatprep.subr.bf16.mxu1 %v2954_v21  ;;  %2736 = vmatprep.mubr.bf16.mxu0 %v2963_v22 }
  0x76   : > { %2760 = vmatprep.mubr.bf16.mxu1 %v2964_v23 }
  0x77   : > { %2727 = vmatpush3.bf16.msra.mxu0 %v2953_v20 }
  0x78   : > { %2751 = vmatpush3.bf16.msra.mxu1 %v2954_v21  ;;  %2728 = vmatprep.subr.bf16.mxu0 %v2955_v24 }
  0x79   : > { %2752 = vmatprep.subr.bf16.mxu1 %v2956_v25 }
  0x7b   : > { %2729 = vmatpush3.bf16.msra.mxu0 %v2955_v24 }
  0x7c   : > { %2753 = vmatpush3.bf16.msra.mxu1 %v2956_v25  ;;  %2730 = vmatprep.subr.bf16.mxu0 %v2957_v26 }
  0x7d   : > { %2754 = vmatprep.subr.bf16.mxu1 %v2958_v27 }
  0x7f   : > { %2731 = vmatpush3.bf16.msra.mxu0 %v2957_v26 }
  0x80   : > { %2755 = vmatpush3.bf16.msra.mxu1 %v2958_v27  ;;  %2732 = vmatprep.subr.bf16.mxu0 %v2959_v28 }
  0x81   : > { %2756 = vmatprep.subr.bf16.mxu1 %v2960_v29 }
  0x83   : > { %2733 = vmatpush3.bf16.msra.mxu0 %v2959_v28 }
  0x84   : > { %2757 = vmatpush3.bf16.msra.mxu1 %v2960_v29  ;;  %2734 = vmatprep.subr.bf16.mxu0 %v2961_v30 }
  0x85   : > { %2758 = vmatprep.subr.bf16.mxu1 %v2962_v31 }
  0x87   : > { %2735 = vmatpush3.bf16.msra.mxu0 %v2961_v30 }
  0x88   : > { %2759 = vmatpush3.bf16.msra.mxu1 %v2962_v31  ;;  %2768 = vmatprep.subr.bf16.mxu0 %v2967_v33 }
  0x89   : > { %2792 = vmatprep.subr.bf16.mxu1 %v2968_v34 }
  0x8a   : > { %2737 = vmatmul.mubr.bf16.vlgmr.msra.gmra.mxu0 %v2965_v32 }
  0x8b   : > { %2761 = vmatmul.mubr.bf16.vlgmr.msra.gmra.mxu1 %v2966_v35  ;;  %2769 = vmatpush3.bf16.msra.mxu0 %v2967_v33 }
  0x8c   : > { %2793 = vmatpush3.bf16.msra.mxu1 %v2968_v34  ;;  %2770 = vmatprep.subr.bf16.mxu0 %v2969_v36 }
  0x8d   : > { %2794 = vmatprep.subr.bf16.mxu1 %v2970_v37  ;;  %2740 = vmatprep.mubr.bf16.mxu0 %v2971_v38 }
  0x8e   : > { %2764 = vmatprep.mubr.bf16.mxu1 %v2975_v39 }
  0x8f   : > { %2771 = vmatpush3.bf16.msra.mxu0 %v2969_v36 }
  0x90   : > { %2795 = vmatpush3.bf16.msra.mxu1 %v2970_v37  ;;  %2772 = vmatprep.subr.bf16.mxu0 %v2973_v41 }
  0x91   : > { %2796 = vmatprep.subr.bf16.mxu1 %v2974_v42 }
  0x92   : > { %2741 = vmatmul.mubr.bf16.gmra.mxu0 %v2972_v40 }
  0x93   : > { %2773 = vmatpush3.bf16.msra.mxu0 %v2973_v41  ;;  %2765 = vmatmul.mubr.bf16.gmra.mxu1 %v2976_v43 }
  0x94   : > { %2797 = vmatpush3.bf16.msra.mxu1 %v2974_v42  ;;  %2774 = vmatprep.subr.bf16.mxu0 %v2977_v44 }
  0x95   : > { %2798 = vmatprep.subr.bf16.mxu1 %v2978_v45  ;;  %2784 = vmatprep.mubr.bf16.mxu0 %v2987_v46 }
  0x96   : > { %2808 = vmatprep.mubr.bf16.mxu1 %v2988_v47 }
  0x97   : > { %2775 = vmatpush3.bf16.msra.mxu0 %v2977_v44 }
  0x98   : > { %2799 = vmatpush3.bf16.msra.mxu1 %v2978_v45  ;;  %2776 = vmatprep.subr.bf16.mxu0 %v2979_v48 }
  0x99   : > { %2800 = vmatprep.subr.bf16.mxu1 %v2980_v49 }
  0x9b   : > { %2777 = vmatpush3.bf16.msra.mxu0 %v2979_v48 }
  0x9c   : > { %2801 = vmatpush3.bf16.msra.mxu1 %v2980_v49  ;;  %2778 = vmatprep.subr.bf16.mxu0 %v2981_v50 }
  0x9d   : > { %2802 = vmatprep.subr.bf16.mxu1 %v2982_v51 }
  0x9f   : > { %2779 = vmatpush3.bf16.msra.mxu0 %v2981_v50 }
  0xa0   : > { %2803 = vmatpush3.bf16.msra.mxu1 %v2982_v51  ;;  %2780 = vmatprep.subr.bf16.mxu0 %v2983_v52 }
  0xa1   : > { %2804 = vmatprep.subr.bf16.mxu1 %v2984_v53 }
  0xa3   : > { %2781 = vmatpush3.bf16.msra.mxu0 %v2983_v52 }
  0xa4   : > { %2805 = vmatpush3.bf16.msra.mxu1 %v2984_v53  ;;  %2782 = vmatprep.subr.bf16.mxu0 %v2985_v54 }
  0xa5   : > { %2806 = vmatprep.subr.bf16.mxu1 %v2986_v55 }
  0xa7   : > { %2783 = vmatpush3.bf16.msra.mxu0 %v2985_v54 }
  0xa8   : > { %2807 = vmatpush3.bf16.msra.mxu1 %v2986_v55  ;;  %2816 = vmatprep.subr.bf16.mxu0 %v2991_v56 }
  0xa9   : > { %2840 = vmatprep.subr.bf16.mxu1 %v2991_v56 }
  0xaa   : > { %2785 = vmatmul.mubr.bf16.vlgmr.msra.gmra.mxu0 %v2989_v57 }
  0xab   : > { %2809 = vmatmul.mubr.bf16.vlgmr.msra.gmra.mxu1 %v2990_v58  ;;  %2817 = vmatpush3.bf16.msra.mxu0 %v2991_v56 }
  0xac   : > { %2848 = vmatpush3.bf16.msra.mxu1 %v2991_v56  ;;  %2818 = vmatprep.subr.bf16.mxu0 %v2992_v59 }
  0xad   : > { %2841 = vmatprep.subr.bf16.mxu1 %v2992_v59  ;;  %2788 = vmatprep.mubr.bf16.mxu0 %v2993_v60 }
  0xae   : > { %2812 = vmatprep.mubr.bf16.mxu1 %v2996_v61 }
  0xaf   : > { %2819 = vmatpush3.bf16.msra.mxu0 %v2992_v59 }
  0xb0   : > { %2849 = vmatpush3.bf16.msra.mxu1 %v2992_v59  ;;  %2820 = vmatprep.subr.bf16.mxu0 %v2995_v62 }
  0xb1   : > { %2842 = vmatprep.subr.bf16.mxu1 %v2995_v62 }
  0xb2   : > { %2789 = vmatmul.mubr.bf16.gmra.mxu0 %v2994_v63 }
  0xb3   : > { %2821 = vmatpush3.bf16.msra.mxu0 %v2995_v62  ;;  %2813 = vmatmul.mubr.bf16.gmra.mxu1 %v2997_v0 }
  0xb4   : > { %2850 = vmatpush3.bf16.msra.mxu1 %v2995_v62  ;;  %2822 = vmatprep.subr.bf16.mxu0 %v2998_v1 }
  0xb5   : > { %2843 = vmatprep.subr.bf16.mxu1 %v2998_v1  ;;  %2832 = vmatprep.mubr.bf16.mxu0 %v3003_v2 }
  0xb6   : > { %2836 = vmatprep.mubr.bf16.mxu1 %v3004_v3 }
  0xb7   : > { %2823 = vmatpush3.bf16.msra.mxu0 %v2998_v1 }
  0xb8   : > { %2851 = vmatpush3.bf16.msra.mxu1 %v2998_v1  ;;  %2824 = vmatprep.subr.bf16.mxu0 %v2999_v4 }
  0xb9   : > { %2844 = vmatprep.subr.bf16.mxu1 %v2999_v4 }
  0xbb   : > { %2825 = vmatpush3.bf16.msra.mxu0 %v2999_v4 }
  0xbc   : > { %2852 = vmatpush3.bf16.msra.mxu1 %v2999_v4  ;;  %2826 = vmatprep.subr.bf16.mxu0 %v3000_v5 }
  0xbd   : > { %2845 = vmatprep.subr.bf16.mxu1 %v3000_v5 }
  0xbf   : > { %2827 = vmatpush3.bf16.msra.mxu0 %v3000_v5 }
  0xc0   : > { %2853 = vmatpush3.bf16.msra.mxu1 %v3000_v5  ;;  %2828 = vmatprep.subr.bf16.mxu0 %v3001_v6 }
  0xc1   : > { %2846 = vmatprep.subr.bf16.mxu1 %v3001_v6 }
  0xc3   : > { %2829 = vmatpush3.bf16.msra.mxu0 %v3001_v6 }
  0xc4   : > { %2854 = vmatpush3.bf16.msra.mxu1 %v3001_v6  ;;  %2830 = vmatprep.subr.bf16.mxu0 %v3002_v7 }
  0xc5   : > { %2847 = vmatprep.subr.bf16.mxu1 %v3002_v7 }
  0xc7   : > { %2831 = vmatpush3.bf16.msra.mxu0 %v3002_v7 }
  0xc8   : > { %2855 = vmatpush3.bf16.msra.mxu1 %v3002_v7 }
  0xca   : > { %2833 = vmatmul.mubr.bf16.vlgmr.msra.gmra.mxu0 %v3005_v8 }
  0xcb   : > { %2837 = vmatmul.mubr.bf16.vlgmr.msra.gmra.mxu1 %v3006_v9 }
 0x10a   : > { %v2642_v10 = vpop.f32.mrf.mxu0 }
 0x10b   : > { %v2666_v12 = vpop.f32.mrf.mxu1 }
 0x10c   : > { %v635_v11 = vpop.f32.mrf.mxu0  ;;  %v781_v63 = vadd.f32 %v2666_v12, %v2642_v10 }
 0x10d   : > { %v772_v14 = vpop.f32.mrf.mxu1 }
 0x10e   : > { %v2643_v13 = vpop.f32.mrf.mxu0  ;;  %v773_v3 = vadd.f32 %v772_v14, %v635_v11 }
 0x10f   : > { %v2667_v17 = vpop.f32.mrf.mxu1 }
 0x110   : > { %v638_v15 = vpop.f32.mrf.mxu0  ;;  %v784_v7 = vadd.f32 %v2667_v17, %v2643_v13 }
 0x111   : > { %v775_v19 = vpop.f32.mrf.mxu1 }
 0x112   : > { %v2646_v16 = vpop.f32.mrf.mxu0  ;;  %v776_v12 = vadd.f32 %v775_v19, %v638_v15 }
 0x113   : > { %v2670_v20 = vpop.f32.mrf.mxu1 }
 0x114   : > { %v651_v18 = vpop.f32.mrf.mxu0  ;;  %v797_v1 = vadd.f32 %v2670_v20, %v2646_v16 }
 0x115   : > { %v788_v22 = vpop.f32.mrf.mxu1 }
 0x116   : > { %v2647_v21 = vpop.f32.mrf.mxu0  ;;  %v789_v5 = vadd.f32 %v788_v22, %v651_v18 }
 0x117   : > { %v2671_v25 = vpop.f32.mrf.mxu1 }
 0x118   : > { %v654_v23 = vpop.f32.mrf.mxu0 }
 0x119   : > { %v791_v27 = vpop.f32.mrf.mxu1 }
 0x11a   : > { %v792_v11 = vadd.f32 %v791_v27, %v654_v23 }
 0x12a   : > { %v2690_v24 = vpop.f32.mrf.mxu0 }
 0x12b   : > { %v2714_v28 = vpop.f32.mrf.mxu1  ;;  %v968_v4 = vadd.f32 %v2690_v24, %v781_v63 }
 0x12c   : > { %v935_v26 = vpop.f32.mrf.mxu0 }
 0x12d   : > { %v1106_v30 = vpop.f32.mrf.mxu1  ;;  %v966_v8 = vadd.f32 %v935_v26, %v773_v3 }
 0x12e   : > { %v2691_v29 = vpop.f32.mrf.mxu0 }
 0x12f   : > { %v2715_v32 = vpop.f32.mrf.mxu1  ;;  %v969_v16 = vadd.f32 %v2691_v29, %v784_v7  ;;  %v1137_v63 = vadd.f32 %v1106_v30, %v966_v8 }
 0x130   : > { %v938_v31 = vpop.f32.mrf.mxu0 }
 0x131   : > { %v1109_v34 = vpop.f32.mrf.mxu1  ;;  %v967_v18 = vadd.f32 %v938_v31, %v776_v12  ;;  %v1140_v26 = vadd.f32 %v2715_v32, %v969_v16 }
 0x132   : > { %v2694_v33 = vpop.f32.mrf.mxu0 }
 0x133   : > { %v2718_v36 = vpop.f32.mrf.mxu1  ;;  %v972_v6 = vadd.f32 %v2694_v33, %v797_v1 }
 0x134   : > { %v951_v35 = vpop.f32.mrf.mxu0 }
 0x135   : > { %v1122_v38 = vpop.f32.mrf.mxu1  ;;  %v1143_v14 = vadd.f32 %v2718_v36, %v972_v6 }
 0x136   : > { %v2695_v37 = vpop.f32.mrf.mxu0 }
 0x137   : > { %v2719_v40 = vpop.f32.mrf.mxu1 }
 0x138   : > { %v954_v39 = vpop.f32.mrf.mxu0 }
 0x139   : > { %v1125_v42 = vpop.f32.mrf.mxu1  ;;  %v971_v33 = vadd.f32 %v954_v39, %v792_v11 }
 0x14a   : > { %v2738_v41 = vpop.f32.mrf.mxu0 }
 0x14b   : > { %v2762_v44 = vpop.f32.mrf.mxu1 }
 0x14c   : > { %v1277_v43 = vpop.f32.mrf.mxu0 }
 0x14d   : > { %v1448_v46 = vpop.f32.mrf.mxu1  ;;  %v1308_v3 = vadd.f32 %v1277_v43, %v1137_v63 }
 0x14e   : > { %v2739_v45 = vpop.f32.mrf.mxu0 }
 0x14f   : > { %v2763_v48 = vpop.f32.mrf.mxu1  ;;  %v1311_v19 = vadd.f32 %v2739_v45, %v1140_v26  ;;  %v1479_v36 = vadd.f32 %v1448_v46, %v1308_v3 }
 0x150   : > { %v1280_v47 = vpop.f32.mrf.mxu0 }
 0x151   : > { %v3431_v50 = vpop.f32.mrf.mxu1  ;;  %v1482_v32 = vadd.f32 %v2763_v48, %v1311_v19 }
 0x152   : > { %v2742_v49 = vpop.f32.mrf.mxu0  ;;  %3472 = vst [vmem:[#allocation3_spill] sm:$0xff] %v3431_v50  ;;  %v800_v50 = vadd.f32 %v2671_v25, %v2647_v21 }
 0x153   : > { %v2766_v51 = vpop.f32.mrf.mxu1  ;;  %v1314_v13 = vadd.f32 %v2742_v49, %v1143_v14 }
 0x154   : > { %v1293_v52 = vpop.f32.mrf.mxu0  ;;  %v973_v24 = vadd.f32 %v2695_v37, %v800_v50 }
 0x155   : > { %v1464_v53 = vpop.f32.mrf.mxu1  ;;  %v1485_v29 = vadd.f32 %v2766_v51, %v1314_v13 }
 0x156   : > { %v2743_v54 = vpop.f32.mrf.mxu0  ;;  %v1144_v21 = vadd.f32 %v2719_v40, %v973_v24 }
 0x157   : > { %v2767_v55 = vpop.f32.mrf.mxu1 }
 0x158   : > { %v1296_v56 = vpop.f32.mrf.mxu0  ;;  %v1315_v23 = vadd.f32 %v2743_v54, %v1144_v21 }
 0x159   : > { %v1467_v58 = vpop.f32.mrf.mxu1 }
 0x15a   : > { %v1486_v49 = vadd.f32 %v2767_v55, %v1315_v23 }
 0x16a   : > { %v2786_v57 = vpop.f32.mrf.mxu0 }
 0x16b   : > { %v2810_v59 = vpop.f32.mrf.mxu1 }
 0x16c   : > { %v1618_v60 = vpop.f32.mrf.mxu0 }
 0x16d   : > { %v3433_v61 = vpop.f32.mrf.mxu1  ;;  %v1649_v43 = vadd.f32 %v1618_v60, %v1479_v36 }
 0x16e   : > { %3473 = vst [vmem:[#allocation4_spill] sm:$0xff] %v3433_v61  ;;  %v2787_v62 = vpop.f32.mrf.mxu0  ;;  %v970_v61 = vadd.f32 %v951_v35, %v789_v5  ;;  %v1138_v35 = vadd.f32 %v1109_v34, %v967_v18  ;;  %v3476_v34 = vld [vmem:[#allocation3_spill] sm:$0xff] }
 0x16f   : > { %v3435_v0 = vpop.f32.mrf.mxu1 }
 0x170   : > { %3474 = vst [vmem:[#allocation5_spill] sm:$0xff] %v3435_v0  ;;  %v1621_v2 = vpop.f32.mrf.mxu0  ;;  %v1139_v0 = vadd.f32 %v2714_v28, %v968_v4  ;;  %v1141_v1 = vadd.f32 %v1122_v38, %v970_v61  ;;  %v1142_v28 = vadd.f32 %v1125_v42, %v971_v33  ;;  %v1309_v30 = vadd.f32 %v1280_v47, %v1138_v35 }
 0x171   : > { %v3437_v9 = vpop.f32.mrf.mxu1  ;;  %v1652_v42 = vadd.f32 %v2787_v62, %v1482_v32 }
 0x172   : > { %3475 = vst [vmem:[#allocation6_spill] sm:$0xff] %v3437_v9  ;;  %v2790_v10 = vpop.f32.mrf.mxu0  ;;  %v1310_v22 = vadd.f32 %v2738_v41, %v1139_v0  ;;  %v1312_v25 = vadd.f32 %v1293_v52, %v1141_v1  ;;  %v1313_v39 = vadd.f32 %v1296_v56, %v1142_v28 }
 0x173   : > { %v2814_v20 = vpop.f32.mrf.mxu1  ;;  %v1655_v41 = vadd.f32 %v2790_v10, %v1485_v29 }
 0x174   : > { %v1634_v17 = vpop.f32.mrf.mxu0  ;;  %v1481_v15 = vadd.f32 %v2762_v44, %v1310_v22  ;;  %v1483_v38 = vadd.f32 %v1464_v53, %v1312_v25  ;;  %v1480_v44 = vadd.f32 %v3476_v34, %v1309_v30  ;;  %v1484_v52 = vadd.f32 %v1467_v58, %v1313_v39 }
 0x175   : > { %v1804_v9 = vpop.f32.mrf.mxu1  ;;  %v1825_v46 = vadd.f32 %v2814_v20, %v1655_v41  ;;  %v3477_v53 = vld [vmem:[#allocation4_spill] sm:$0xff] }
 0x176   : > { %v2791_v27 = vpop.f32.mrf.mxu0  ;;  %v1651_v31 = vadd.f32 %v2786_v57, %v1481_v15  ;;  %v1653_v40 = vadd.f32 %v1634_v17, %v1483_v38  ;;  %v1819_v56 = vadd.f32 %v3477_v53, %v1649_v43  ;;  %v1650_v57 = vadd.f32 %v1621_v2, %v1480_v44 }
 0x177   : > { %v2815_v37 = vpop.f32.mrf.mxu1  ;;  %v1656_v47 = vadd.f32 %v2791_v27, %v1486_v49  ;;  %v3478_v4 = vld [vmem:[#allocation5_spill] sm:$0xff] }
 0x178   : > { %v1637_v50 = vpop.f32.mrf.mxu0  ;;  %v1821_v45 = vadd.f32 %v2810_v59, %v1651_v31  ;;  %v1823_v55 = vadd.f32 %v1804_v9, %v1653_v40  ;;  %v2473_v59 = vld [vmem:[%s3470_s2] ss:$0 sm:$0xff]  ;;  %v1822_v58 = vadd.f32 %v3478_v4, %v1652_v42 }
 0x179   : > { %v1807_v51 = vpop.f32.mrf.mxu1  ;;  %v1654_v61 = vadd.f32 %v1637_v50, %v1484_v52  ;;  %v1826_v7 = vadd.f32 %v2815_v37, %v1656_v47  ;;  %v3479_v2 = vld [vmem:[#allocation6_spill] sm:$0xff] }
 0x17a   : > { %v1820_v12 = vadd.f32 %v3479_v2, %v1650_v57 }
 0x17b   : > { %v1824_v11 = vadd.f32 %v1807_v51, %v1654_v61 }
 0x18a   : > { %v2834_v54 = vpop.f32.mrf.mxu0 }
 0x18b   : > { %v1991_v48 = vadd.f32 %v2834_v54, %v1821_v45  ;;  %v2838_v60 = vpop.f32.mrf.mxu1 }
 0x18c   : > { %v1995_v62 = vadd.f32 %v2838_v60, %v1825_v46  ;;  %v1958_v0 = vpop.f32.mrf.mxu0 }
 0x18d   : > { %v1989_v5 = vadd.f32 %v1958_v0, %v1819_v56  ;;  %v1974_v6 = vpop.f32.mrf.mxu1  ;;  %v2006_v16 = vadd.f32 %v2473_v59, %v1991_v48 }
 0x18e   : > { %v1993_v8 = vadd.f32 %v1974_v6, %v1823_v55  ;;  %v2835_v10 = vpop.f32.mrf.mxu0  ;;  %v2010_v14 = vadd.f32 %v2473_v59, %v1995_v62 }
 0x18f   : > { %v1992_v9 = vadd.f32 %v2835_v10, %v1822_v58  ;;  %v2839_v20 = vpop.f32.mrf.mxu1  ;;  %v2004_v18 = vadd.f32 %v2473_v59, %v1989_v5  ;;  %v2014_v3 = vmax.f32 %v2006_v16, 0.0 }
 0x190   : > { %v1996_v24 = vadd.f32 %v2839_v20, %v1826_v7  ;;  %v1961_v63 = vpop.f32.mrf.mxu0  ;;  %v2008_v13 = vadd.f32 %v2473_v59, %v1993_v8  ;;  %v2018_v35 = vmax.f32 %v2010_v14, 0.0 }
 0x191   : > { %v2007_v22 = vadd.f32 %v2473_v59, %v1992_v9  ;;  %v1990_v1 = vadd.f32 %v1961_v63, %v1820_v12  ;;  %v1977_v33 = vpop.f32.mrf.mxu1  ;;  %v2012_v28 = vmax.f32 %v2004_v18, 0.0 }
 0x192   : > { %v2011_v17 = vadd.f32 %v2473_v59, %v1996_v24  ;;  %v1994_v26 = vadd.f32 %v1977_v33, %v1824_v11  ;;  %v2016_v27 = vmax.f32 %v2008_v13, 0.0 }
 0x193   : > { %v2015_v21 = vmax.f32 %v2007_v22, 0.0  ;;  %v2005_v25 = vadd.f32 %v2473_v59, %v1990_v1 }
 0x194   : > { %v2019_v15 = vmax.f32 %v2011_v17, 0.0  ;;  %v2009_v19 = vadd.f32 %v2473_v59, %v1994_v26 }
 0x195   : > { %v2501_v29 = vpack.c.bf16 %v2015_v21, %v2014_v3  ;;  %v2013_v23 = vmax.f32 %v2005_v25, 0.0 }
 0x196   : > { %v2511_v36 = vpack.c.bf16 %v2019_v15, %v2018_v35  ;;  %v2017_v30 = vmax.f32 %v2009_v19, 0.0 }
 0x197   : > { %2513 = vst [vmem:[%s477_s11 + $0x8] sm:$0xff] %v2501_v29   ;;  %v2496_v31 = vpack.c.bf16 %v2013_v23, %v2012_v28 }
 0x198   : > { %2515 = vst [vmem:[%s477_s11 + $0x18] sm:$0xff] %v2511_v36   ;;  %v2506_v37 = vpack.c.bf16 %v2017_v30, %v2016_v27 }
 0x199   : > { %2497 = vst [vmem:[%s477_s11] sm:$0xff] %v2496_v31  }
 0x19a   : > { %2514 = vst [vmem:[%s477_s11 + $0x10] sm:$0xff] %v2506_v37  }
 0x19b PF: > { %s13_s16 = sadd.s32 1, %s3045_s16   ;;  %s3480_s12 = smov %s3033_s13 }
 0x19c   : > { %p10_p10 = scmp.ge.s32.totalorder %s13_s16, 4   ;;  %s3481_s13 = smov %s3102_s20 }
 0x19d   : > { %s3482_s14 = smov %s3041_s15  ;;  %s3483_s15 = smov %s3485_s17 }
 0x19e   :  { %12 = sbr.rel (!%p10_p10) target bundleno = 3 (0x3), region = 127 }

// kernel: bottleneck_forward.5
= control target key start
LH: loop header
LB: loop body
LE: loop exit
PB: predicated region body
PF: predicated region fallthrough
CT: control target
= control target key end

     0   :  { %10 = vsyncpa [#allocation3], 0  ;;  %s1307_s0 = inlined_call_operand.vmem [shape: bf16[128,128], index: 0, kind: input, shape index: {}]   ;;  %s1308_s1 = inlined_call_operand.vmem [shape: bf16[128,128], index: 1, kind: input, shape index: {}]   ;;  %s1309_s2 = inlined_call_operand.vmem [shape: bf16[128,128], index: 2, kind: input, shape index: {}]   ;;  %s1310_s3 = inlined_call_operand.vmem [shape: bf16[128,128], index: 3, kind: input, shape index: {}]   ;;  %s1311_s4 = inlined_call_operand.vmem [shape: f32[1,128], index: 4, kind: input, shape index: {}]   ;;  %s1312_s5 = inlined_call_operand.hbm [shape: f32[128,128], index: 5, kind: output, shape index: {}]  }
   0x1   :  { %12 = vsyncpa [#allocation3 + $0x1], 0  ;;  %s1113_s18 = smov 0   ;;  %s1115_s19 = smov 0  }
   0x2   :  { %s1117_s20 = smov 0   ;;  %s1119_s21 = smov 0  }
   0x3   :  { %s1121_s22 = smov 0   ;;  %s1123_s23 = smov 0  }
   0x4 LB: > { %s805_s24 = sadd.s32 4294967295, %s1078_s23   ;;  %s806_s25 = sadd.s32 4294967294, %s1078_s23   ;;  %s1078_s23 = sphi %s1123_s23, %s18_s23   ;;  %s1074_s22 = sphi %s1121_s22, %s1319_s22   ;;  %s1070_s21 = sphi %s1119_s21, %s1318_s21   ;;  %s1066_s20 = sphi %s1117_s20, %s1317_s20   ;;  %s1062_s19 = sphi %s1115_s19, %s1316_s19   ;;  %s1058_s18 = sphi %s1113_s18, %s1315_s18  }
   0x5   : > { %s30_s26 = sadd.s32 1, %s1074_s22  ;;  %s169_s27 = sadd.s32 1, %s1066_s20 }
   0x6   : > { %p32_p0 = scmp.ge.s32.totalorder %s30_s26, 2  ;;  %p179_p1 = scmp.ne.s32.totalorder %s1066_s20, %s1062_s19 }
   0x7   : > { %p180_p2 = scmp.eq.s32.totalorder %s805_s24, 1  ;;  %p185_p3 = scmp.ne.s32.totalorder %s1062_s19, %s1058_s18 }
   0x8   : > { %s1321_s26 = smov (%p32_p0, %s30_s26), 0  ;;  %p186_p5 = scmp.eq.s32.totalorder %s806_s25, 1 }
   0x9   : > { %p1153_p4 = por %p180_p2, %p179_p1  ;;  %s164_s29 = ssub.s32 %s1074_s22, %s1321_s26 }
   0xa   : > { %p812_p6 = scmp.ge.s32.totalorder %s1078_s23, 1  ;;  %p167_p7 = scmp.eq.s32.totalorder %s164_s29, 0 }
   0xb   : > { %p1160_p8 = por %p186_p5, %p185_p3  ;;  %p242_p9 = scmp.lt.s32.totalorder %s1078_s23, 3 }
   0xc   : > { %s1166_s6 = scalar_select %p167_p7, %s1066_s20, %s169_s27  }
   0xd   : > { %p243_p10 = pnand %p812_p6, %p242_p9 }
   0xe   : > { %s814_s9 = sshll.u32 (!%p243_p10), %s1070_s21, 3  ;;  %s283_s25 = sand.u32 (!%p243_p10), 1, %s1062_s19  }
   0xf   : > { %246 = sbr.rel (%p243_p10) target bundleno = 281 (0x119), region = 40  ;;  %p287_p11 = scmp.lt.s32.totalorder (!%p243_p10), %s814_s9, 15 }
  0x10   : > { %s813_s7 = sshll.u32 (!%p243_p10), %s283_s25, 6  ;;  %s1262_s13 = scalar_lea.sflag (!%p243_p10), [#allocation3], %s283_s25 }
  0x11   : > { %s1080_s14 = smov (!%p243_p10), [#allocation2]  }
  0x12   : > { %s1006_s15 = sshll.u32 (!%p243_p10), %s1080_s14, 4  ;;  %s1007_s15 = int_to_ptr.vmem [resolvable:$false] %s1006_s15 }
  0x13   : > { %s1008_s16 = scalar_lea.vmem (!%p243_p10), %s1007_s15, 2048 }
  0x14   : > { %v978_v0 = vld [vmem:[%s1310_s3 + $0x38] sm:$0xff]   ;;  %v980_v2 = vld [vmem:[%s1310_s3 + $0x30] sm:$0xff]   ;;  %v982_v4 = vld [vmem:[%s1310_s3 + $0x28] sm:$0xff]   ;;  %s1323_s9 = smov (!%p287_p11, %s814_s9), 15 }
  0x15   : > { %v979_v1 = vld [vmem:[%s1308_s1 + $0x38] sm:$0xff]   ;;  %873 = vmatprep.subr.bf16.mxu0 %v978_v0  ;;  %v981_v3 = vld [vmem:[%s1308_s1 + $0x30] sm:$0xff]   ;;  %v983_v5 = vld [vmem:[%s1308_s1 + $0x28] sm:$0xff]   ;;  %s815_s10 = sshll.u32 %s1323_s9, 2 }
  0x16   : > { %897 = vmatprep.subr.bf16.mxu1 %v979_v1  ;;  %874 = vmatpush3.bf16.msra.mxu0 %v978_v0  ;;  %v984_v6 = vld [vmem:[%s1310_s3 + $0x20] sm:$0xff]   ;;  %v986_v8 = vld [vmem:[%s1310_s3 + $0x18] sm:$0xff]   ;;  %s1202_s17 = scalar_lea.vmem %s1309_s2, %s815_s10  ;;  %v988_v10 = vld [vmem:[%s1310_s3 + $0x10] sm:$0xff]   ;;  %s1210_s29 = scalar_lea.vmem %s1307_s0, %s815_s10 }
  0x17   : > { %898 = vmatpush3.bf16.msra.mxu1 %v979_v1  ;;  %875 = vmatprep.subr.bf16.mxu0 %v980_v2  ;;  %v985_v7 = vld [vmem:[%s1308_s1 + $0x20] sm:$0xff]   ;;  %v987_v9 = vld [vmem:[%s1308_s1 + $0x18] sm:$0xff]   ;;  %v989_v11 = vld [vmem:[%s1308_s1 + $0x10] sm:$0xff]  }
  0x18   : > { %899 = vmatprep.subr.bf16.mxu1 %v981_v3  ;;  %v994_v12 = vld [vmem:[%s1202_s17] sm:$0xff]   ;;  %v990_v14 = vld [vmem:[%s1310_s3 + $0x8] sm:$0xff]   ;;  %v998_v20 = vld [vmem:[%s1202_s17 + $0x10] sm:$0xff]  }
  0x19   : > { %v995_v13 = vld [vmem:[%s1210_s29] sm:$0xff]   ;;  %889 = vmatprep.mubr.bf16.mxu0 %v994_v12  ;;  %v991_v15 = vld [vmem:[%s1308_s1 + $0x8] sm:$0xff]   ;;  %v999_v21 = vld [vmem:[%s1210_s29 + $0x10] sm:$0xff]  }
  0x1a   : > { %876 = vmatpush3.bf16.msra.mxu0 %v980_v2  ;;  %913 = vmatprep.mubr.bf16.mxu1 %v995_v13  ;;  %v992_v16 = vld [vmem:[%s1310_s3] sm:$0xff]   ;;  %v996_v18 = vld [vmem:[%s1202_s17 + $0x8] sm:$0xff]   ;;  %v1000_v22 = vld [vmem:[%s1202_s17 + $0x18] sm:$0xff]   ;;  %s1241_s17 = scalar_lea.vmem [#allocation2], %s813_s7 }
  0x1b   : > { %900 = vmatpush3.bf16.msra.mxu1 %v981_v3  ;;  %877 = vmatprep.subr.bf16.mxu0 %v982_v4  ;;  %v993_v17 = vld [vmem:[%s1308_s1] sm:$0xff]   ;;  %v997_v19 = vld [vmem:[%s1210_s29 + $0x8] sm:$0xff]   ;;  %v1001_v23 = vld [vmem:[%s1210_s29 + $0x18] sm:$0xff]   ;;  %s848_s29 = sshll.u32 %s1070_s21, 10  ;;  %s679_s8 = sshll.u32 %s1241_s17, 4  ;;  %s1256_s8 = int_to_ptr.vmem [resolvable:$true] %s679_s8 }
  0x1c   : > { %901 = vmatprep.subr.bf16.mxu1 %v983_v5  ;;  %v842_v26 = vld [vmem:[%s1311_s4] ss:$0 sm:$0xff]  ;;  %s1254_s12 = scalar_lea.hbm %s1312_s5, %s848_s29  ;;  %s1002_s21 = scalar_lea.vmem %s1256_s8, 1024 }
  0x1d   : > { %p1003_p12 = scmp.ne.s32.totalorder %s1256_s8, %s1002_s21  ;;  %p1009_p1 = scmp.lt.s32.totalorder %s1256_s8, %s1007_s15 }
  0x1e   : > { %878 = vmatpush3.bf16.msra.mxu0 %v982_v4  ;;  %p1010_p2 = scmp.lt.s32.totalorder %s1008_s16, %s1002_s21 }
  0x1f   : > { %902 = vmatpush3.bf16.msra.mxu1 %v983_v5  ;;  %879 = vmatprep.subr.bf16.mxu0 %v984_v6  ;;  %p1004_p13 = pnand %p1003_p12, %p1153_p4 }
  0x20   : > { %903 = vmatprep.subr.bf16.mxu1 %v985_v7  ;;  %p1011_p3 = por %p1010_p2, %p1009_p1 }
  0x21   : > { %p1005_p0 = pneg %p1004_p13 }
  0x22   : > { %880 = vmatpush3.bf16.msra.mxu0 %v984_v6 }
  0x23   : > { %904 = vmatpush3.bf16.msra.mxu1 %v985_v7  ;;  %881 = vmatprep.subr.bf16.mxu0 %v986_v8  ;;  %p1012_p5 = pnand %p1011_p3, %p1005_p0 }
  0x24   : > { %905 = vmatprep.subr.bf16.mxu1 %v987_v9 }
  0x26   : > { %882 = vmatpush3.bf16.msra.mxu0 %v986_v8 }
  0x27   : > { %906 = vmatpush3.bf16.msra.mxu1 %v987_v9  ;;  %883 = vmatprep.subr.bf16.mxu0 %v988_v10 }
  0x28   : > { %907 = vmatprep.subr.bf16.mxu1 %v989_v11 }
  0x2a   : > { %884 = vmatpush3.bf16.msra.mxu0 %v988_v10 }
  0x2b   : > { %908 = vmatpush3.bf16.msra.mxu1 %v989_v11  ;;  %885 = vmatprep.subr.bf16.mxu0 %v990_v14 }
  0x2c   : > { %909 = vmatprep.subr.bf16.mxu1 %v991_v15 }
  0x2e   : > { %886 = vmatpush3.bf16.msra.mxu0 %v990_v14 }
  0x2f   : > { %910 = vmatpush3.bf16.msra.mxu1 %v991_v15  ;;  %887 = vmatprep.subr.bf16.mxu0 %v992_v16 }
  0x30   : > { %911 = vmatprep.subr.bf16.mxu1 %v993_v17 }
  0x32   : > { %888 = vmatpush3.bf16.msra.mxu0 %v992_v16 }
  0x33   : > { %912 = vmatpush3.bf16.msra.mxu1 %v993_v17 }
  0x35   : > { %890 = vmatmul.mubr.bf16.vlgmr.msra.gmra.mxu0 %v996_v18 }
  0x36   : > { %914 = vmatmul.mubr.bf16.vlgmr.msra.gmra.mxu1 %v997_v19  ;;  %893 = vmatprep.mubr.bf16.mxu0 %v998_v20 }
  0x37   : > { %917 = vmatprep.mubr.bf16.mxu1 %v999_v21 }
  0x3d   : > { %894 = vmatmul.mubr.bf16.gmra.mxu0 %v1000_v22 }
  0x3e   : > { %918 = vmatmul.mubr.bf16.gmra.mxu1 %v1001_v23 }
  0xf5   : > { %v891_v24 = vpop.f32.mrf.mxu0 }
  0xf6   : > { %v915_v25 = vpop.f32.mrf.mxu1 }
  0xf7   : > { %v611_v27 = vadd.f32 %v915_v25, %v891_v24  ;;  %v465_v28 = vpop.f32.mrf.mxu0 }
  0xf8   : > { %v602_v29 = vpop.f32.mrf.mxu1 }
  0xf9   : > { %v642_v30 = vadd.f32 %v842_v26, %v611_v27  ;;  %v603_v31 = vadd.f32 %v602_v29, %v465_v28  ;;  %v892_v32 = vpop.f32.mrf.mxu0 }
  0xfa   : > { %v916_v33 = vpop.f32.mrf.mxu1 }
  0xfb   : > { %v650_v34 = vmax.f32 %v642_v30, 0.0  ;;  %v640_v35 = vadd.f32 %v842_v26, %v603_v31  ;;  %v614_v36 = vadd.f32 %v916_v33, %v892_v32  ;;  %v468_v37 = vpop.f32.mrf.mxu0 }
  0xfc   : > { %v605_v38 = vpop.f32.mrf.mxu1 }
  0xfd   : > { %658 = vst [vmem:[%s1241_s17 + $0x10] sm:$0xff] %v650_v34  ;;  %v648_v39 = vmax.f32 %v640_v35, 0.0  ;;  %v643_v40 = vadd.f32 %v842_v26, %v614_v36  ;;  %v606_v41 = vadd.f32 %v605_v38, %v468_v37  ;;  %v895_v42 = vpop.f32.mrf.mxu0 }
  0xfe   : > { %v919_v43 = vpop.f32.mrf.mxu1 }
  0xff   : > { %656 = vst [vmem:[%s1241_s17] sm:$0xff] %v648_v39  ;;  %v651_v44 = vmax.f32 %v643_v40, 0.0  ;;  %v641_v45 = vadd.f32 %v842_v26, %v606_v41  ;;  %v627_v46 = vadd.f32 %v919_v43, %v895_v42  ;;  %v481_v47 = vpop.f32.mrf.mxu0 }
 0x100   : > { %v618_v48 = vpop.f32.mrf.mxu1 }
 0x101   : > { %659 = vst [vmem:[%s1241_s17 + $0x18] sm:$0xff] %v651_v44  ;;  %v649_v49 = vmax.f32 %v641_v45, 0.0  ;;  %v646_v50 = vadd.f32 %v842_v26, %v627_v46  ;;  %v619_v51 = vadd.f32 %v618_v48, %v481_v47  ;;  %v896_v52 = vpop.f32.mrf.mxu0 }
 0x102   : > { %v920_v53 = vpop.f32.mrf.mxu1 }
 0x103   : > { %657 = vst [vmem:[%s1241_s17 + $0x8] sm:$0xff] %v649_v49  ;;  %v654_v54 = vmax.f32 %v646_v50, 0.0  ;;  %v644_v55 = vadd.f32 %v842_v26, %v619_v51  ;;  %v630_v56 = vadd.f32 %v920_v53, %v896_v52  ;;  %v484_v57 = vpop.f32.mrf.mxu0 }
 0x104   : > { %v621_v58 = vpop.f32.mrf.mxu1 }
 0x105   : > { %662 = vst [vmem:[%s1241_s17 + $0x30] sm:$0xff] %v654_v54  ;;  %v652_v59 = vmax.f32 %v644_v55, 0.0  ;;  %v647_v60 = vadd.f32 %v842_v26, %v630_v56  ;;  %v622_v61 = vadd.f32 %v621_v58, %v484_v57 }
 0x107   : > { %660 = vst [vmem:[%s1241_s17 + $0x20] sm:$0xff] %v652_v59  ;;  %v655_v62 = vmax.f32 %v647_v60, 0.0  ;;  %v645_v63 = vadd.f32 %v842_v26, %v622_v61 }
 0x109   : > { %663 = vst [vmem:[%s1241_s17 + $0x38] sm:$0xff] %v655_v62  ;;  %v653_v0 = vmax.f32 %v645_v63, 0.0 }
 0x10b   : > { %661 = vst [vmem:[%s1241_s17 + $0x28] sm:$0xff] %v653_v0 }
 0x10c   : > { %1015 = shalt.err (!%p1012_p5)
}
 0x10d   : > { %s1016_s24 = scalar_lea.hbm %s1254_s12, 1024  ;;  %s1020_s27 = scalar_lea.hbm %s1312_s5, 2048 }
 0x10e   : > { %p1017_p6 = scmp.ne.s32.totalorder %s1254_s12, %s1016_s24  ;;  %p1021_p10 = scmp.lt.s32.totalorder %s1254_s12, %s1312_s5 }
 0x10f   : > { %p1022_p11 = scmp.lt.s32.totalorder %s1020_s27, %s1016_s24 }
 0x110   : > { %p1018_p7 = pnand %p1017_p6, %p1153_p4 }
 0x111   : > { %p1023_p12 = por %p1022_p11, %p1021_p10 }
 0x112   : > { %p1019_p9 = pneg %p1018_p7 }
 0x114   : > { %p1024_p13 = pnand %p1023_p12, %p1019_p9 }
 0x116   : > { %1027 = shalt.err (!%p1024_p13)
}
 0x117   : > { %s1081_s29 = smov 128   ;;  %s1082_s11 = smov 8  }
 0x118   : > { %921 = dma.vmem_to_hbm [thread:$0]  (%p1153_p4), %s1256_s8, 1024, %s1254_s12, %s1262_s13, %s1081_s29, %s1081_s29, %s1082_s11  }
 0x119 PF: > { %p927_p0 = scmp.ge.s32.totalorder %s1078_s23, 2  ;;  %s694_s10 = sand.u32 1, %s1058_s18  }
 0x11a   : > { %s695_s21 = scalar_lea.sflag [#allocation3], %s694_s10 }
 0x11b   : > { %p924_p1 = pnand %p927_p0, %p1160_p8 }
 0x11d   : > { %p925_p2 = pneg %p924_p1 }
 0x11f   : > { %1053 = dma.done.wait (%p925_p2), %s695_s21, 1024  }
 0x120   : > { %1055 = vsyncadd (%p925_p2), %s695_s21, 4294966272  ;;  %s18_s23 = sadd.s32 1, %s1078_s23   ;;  %s1315_s18 = smov %s1062_s19 }
 0x121   : > { %p15_p3 = scmp.ge.s32.totalorder %s18_s23, 4   ;;  %s1316_s19 = smov %s1066_s20 }
 0x122   : > { %s1317_s20 = smov %s1166_s6  ;;  %s1318_s21 = smov %s1074_s22 }
 0x123   : > { %s1319_s22 = smov %s1321_s26  ;;  %17 = sbr.rel (!%p15_p3) target bundleno = 4 (0x4), region = 87 }
 0x128   :  { %700 = vsyncpa [#allocation3], 1 }
 0x129   :  { %702 = vsyncpa [#allocation3 + $0x1], 1 }

</bundles_post_ra>
